<compile_context>
chip_gen: v7x
topology: tpu7x:2x2x1
jax: 0.10.0
libtpu: 0.0.40
codegen_flags: <defaults>
</compile_context>

<pallas_src>
import math

import jax
import jax.numpy as jnp
from jax import lax
from jax.experimental import pallas as pl
from jax.experimental.pallas import tpu as pltpu


# ----------------------------- config ------------------------------------- #
BATCH = 2
SEQ = 8
N_HEADS = 2
HEAD_DIM = 128                 # lane-aligned head dim
HIDDEN = N_HEADS * HEAD_DIM    # 256
INTERMEDIATE = 512
N_LAYERS = 2
ROPE_THETA = 10000.0
RMS_EPS = 1e-6

MXU_DTYPE = jnp.bfloat16       # matmul operand dtype (f32 accumulation)
NEG_INF = -1e30


# ----------------------------- kernel -------------------------------------- #
def _rmsnorm_unscaled(x):
    # RMSNorm without the learned scale (scale is folded into the next matmul).
    var = jnp.mean(x * x, axis=-1, keepdims=True)
    return x * lax.rsqrt(var + RMS_EPS)


def fused_layer_kernel(x_ref, wqkv_ref, wo_ref, wgu_ref, wd_ref,
                       cos_ref, sin_ref, bias_ref, o_ref):
    """One grid step = one layer.  The output block (constant block index)
    stays resident in VMEM and carries the residual stream across layers."""
    l = pl.program_id(0)

    @pl.when(l == 0)
    def _():
        o_ref[...] = x_ref[...]                      # seed residual with input

    resid = o_ref[...].astype(jnp.float32)           # (B*S, H) f32
    cos = cos_ref[...]                               # (B*S, D) f32
    sin = sin_ref[...]                               # (B*S, D) f32 (sign folded)
    bias = bias_ref[...]                             # (B*S, B*S) block-diag causal

    # ------------------- self-attention block ------------------- #
    # in_norm and 1/sqrt(D) are folded into wqkv.
    h = _rmsnorm_unscaled(resid)                                       # (B*S, H)
    qkv = jnp.dot(h.astype(MXU_DTYPE), wqkv_ref[0],
                  preferred_element_type=jnp.float32)                  # (B*S, 3H)

    head_outs = []
    for hh in range(N_HEADS):                        # static 2-way unroll
        q = qkv[:, hh * HEAD_DIM:(hh + 1) * HEAD_DIM]                  # (B*S, D)
        k = qkv[:, HIDDEN + hh * HEAD_DIM:HIDDEN + (hh + 1) * HEAD_DIM]
        v = qkv[:, 2 * HIDDEN + hh * HEAD_DIM:2 * HIDDEN + (hh + 1) * HEAD_DIM]

        # RoPE: x*cos + rotate_half(x)*sin ; rotate_half == roll(x, D/2) * sign
        # (sign already folded into the sin table).
        q = q * cos + pltpu.roll(q, shift=HEAD_DIM // 2, axis=1) * sin
        k = k * cos + pltpu.roll(k, shift=HEAD_DIM // 2, axis=1) * sin

        # scores: (B*S, B*S) = q @ k^T  (scale already folded into Q weights)
        s = lax.dot_general(q.astype(MXU_DTYPE), k.astype(MXU_DTYPE),
                            (((1,), (1,)), ((), ())),
                            preferred_element_type=jnp.float32)
        s = s + bias
        m = jnp.max(s, axis=-1, keepdims=True)
        p = jnp.exp(s - m)
        inv_l = pl.reciprocal(jnp.sum(p, axis=-1, keepdims=True), approx=False)
        o_h = jnp.dot(p.astype(MXU_DTYPE), v.astype(MXU_DTYPE),
                      preferred_element_type=jnp.float32) * inv_l
        head_outs.append(o_h)

    attn = jnp.concatenate(head_outs, axis=-1)       # (B*S, H) f32, lane-aligned
    resid = resid + jnp.dot(attn.astype(MXU_DTYPE), wo_ref[0],
                            preferred_element_type=jnp.float32)

    # ------------------------ MLP block -------------------------- #
    # post_norm is folded into wgu.
    h2 = _rmsnorm_unscaled(resid)
    gu = jnp.dot(h2.astype(MXU_DTYPE), wgu_ref[0],
                 preferred_element_type=jnp.float32)     # (B*S, 2I)
    g = gu[:, :INTERMEDIATE]
    u = gu[:, INTERMEDIATE:]
    act = (g * jax.nn.sigmoid(g)) * u                    # SiLU(gate) * up, f32
    resid = resid + jnp.dot(act.astype(MXU_DTYPE), wd_ref[0],
                            preferred_element_type=jnp.float32)

    o_ref[...] = resid.astype(o_ref.dtype)


# ----------------------------- wrapper -------------------------------------- #
def abbreviated_llama_fused(x, params, cos_full, sin_full, bias):
    B, S, H = x.shape
    D = HEAD_DIM
    R = B * S                                       # merged row count
    x2d = x.reshape(R, H)

    wqkv, wo, wgu, wd = params["wqkv"], params["wo"], params["wgu"], params["wd"]
    L = wqkv.shape[0]

    out2d = pl.pallas_call(
        fused_layer_kernel,
        out_shape=jax.ShapeDtypeStruct((R, H), x.dtype),
        grid=(L,),
        in_specs=[
            pl.BlockSpec((R, H), lambda l: (0, 0)),                        # x
            pl.BlockSpec((1, H, 3 * H), lambda l: (l, 0, 0)),              # wqkv
            pl.BlockSpec((1, H, H), lambda l: (l, 0, 0)),                  # wo
            pl.BlockSpec((1, H, 2 * INTERMEDIATE), lambda l: (l, 0, 0)),   # wgu
            pl.BlockSpec((1, INTERMEDIATE, H), lambda l: (l, 0, 0)),       # wd
            pl.BlockSpec((R, D), lambda l: (0, 0)),                        # cos
            pl.BlockSpec((R, D), lambda l: (0, 0)),                        # sin*sign
            pl.BlockSpec((R, R), lambda l: (0, 0)),                        # causal bias
        ],
        out_specs=pl.BlockSpec((R, H), lambda l: (0, 0)),
        compiler_params=pltpu.CompilerParams(
            dimension_semantics=("arbitrary",)),
    )(x2d, wqkv, wo, wgu, wd, cos_full, sin_full, bias)
    return out2d.reshape(B, S, H)


# ----------------------------- params / tables ------------------------------ #
def init_params(key):
    """Random Llama-layer weights with norm/scale constants folded in offline."""
    std = 0.02
    scale = 1.0 / math.sqrt(HEAD_DIM)
    wqkv, wo, wgu, wd = [], [], [], []
    for _ in range(N_LAYERS):
        keys = jax.random.split(key, 8)
        key = keys[-1]
        wq = std * jax.random.normal(keys[0], (HIDDEN, HIDDEN), jnp.float32)
        wk = std * jax.random.normal(keys[1], (HIDDEN, HIDDEN), jnp.float32)
        wv = std * jax.random.normal(keys[2], (HIDDEN, HIDDEN), jnp.float32)
        in_norm = jnp.ones((HIDDEN,), jnp.float32)       # RMSNorm weight
        post_norm = jnp.ones((HIDDEN,), jnp.float32)
        # Fold 1/sqrt(D) attention scale into Q columns; fold in_norm into rows.
        qkv_cat = jnp.concatenate([wq * scale, wk, wv], axis=1)          # (H, 3H)
        wqkv.append(in_norm[:, None] * qkv_cat)
        wo.append(std * jax.random.normal(keys[3], (HIDDEN, HIDDEN), jnp.float32))
        wg = std * jax.random.normal(keys[4], (HIDDEN, INTERMEDIATE), jnp.float32)
        wu = std * jax.random.normal(keys[5], (HIDDEN, INTERMEDIATE), jnp.float32)
        gu_cat = jnp.concatenate([wg, wu], axis=1)                       # (H, 2I)
        wgu.append(post_norm[:, None] * gu_cat)
        wd.append(std * jax.random.normal(keys[6], (INTERMEDIATE, HIDDEN), jnp.float32))
    return {
        "wqkv": jnp.stack(wqkv).astype(MXU_DTYPE),       # (L, H, 3H) bf16
        "wo": jnp.stack(wo).astype(MXU_DTYPE),           # (L, H, H)  bf16
        "wgu": jnp.stack(wgu).astype(MXU_DTYPE),         # (L, H, 2I) bf16
        "wd": jnp.stack(wd).astype(MXU_DTYPE),           # (L, I, H)  bf16
    }


def rotary_tables(batch, seq_len, head_dim, theta=ROPE_THETA):
    # Matches HF LlamaRotaryEmbedding for position_ids = [0, 1, ..., S-1],
    # repeated per batch element and flattened to (B*S, D).
    inv_freq = 1.0 / (theta ** (jnp.arange(0, head_dim, 2, dtype=jnp.float32) / head_dim))
    pos = jnp.arange(seq_len, dtype=jnp.float32)
    freqs = pos[:, None] * inv_freq[None, :]             # (S, D/2)
    emb = jnp.concatenate([freqs, freqs], axis=-1)       # (S, D)
    cos, sin = jnp.cos(emb), jnp.sin(emb)
    # Fold rotate_half's sign into sin:  rotate_half(x) == roll(x, D/2) * sign,
    # sign = -1 on the first D/2 lanes.
    sign = jnp.concatenate(
        [-jnp.ones((1, head_dim // 2), jnp.float32),
         jnp.ones((1, head_dim // 2), jnp.float32)], axis=-1)
    cos_full = jnp.tile(cos, (batch, 1))                 # (B*S, D)
    sin_full = jnp.tile(sin * sign, (batch, 1))          # (B*S, D)
    return cos_full, sin_full


def block_diag_causal_bias(batch, seq_len):
    # (B*S, B*S) additive bias: causal within each batch element, -inf across
    # batch elements (so merged batch rows never attend to each other).
    idx = jnp.arange(batch * seq_len)
    b = idx // seq_len
    pos = idx % seq_len
    same_batch = b[:, None] == b[None, :]
    causal = pos[None, :] <= pos[:, None]
    return jnp.where(same_batch & causal, 0.0, NEG_INF).astype(jnp.float32)


# ----------------------------- main ----------------------------------------- #
if __name__ == "__main__":
    key = jax.random.PRNGKey(0)
    k_x, k_p = jax.random.split(key)
    x = jax.random.normal(k_x, (BATCH, SEQ, HIDDEN), jnp.float32)
    params = init_params(k_p)
    cos_full, sin_full = rotary_tables(BATCH, SEQ, HEAD_DIM)
    bias = block_diag_causal_bias(BATCH, SEQ)

    fwd = jax.jit(abbreviated_llama_fused)
    out = fwd(x, params, cos_full, sin_full, bias)
    out = jax.block_until_ready(out)
    assert out.shape == (BATCH, SEQ, HIDDEN)
    assert bool(jnp.all(jnp.isfinite(out)))
    print("KERNEL_OK")
</pallas_src>

<mosaic_0001>
module attributes {stable_mosaic.version = 11 : i64} {
  func.func @fused_layer_kernel(%arg0: i32, %arg1: memref<16x256xf32, #tpu.memory_space<vmem>>, %arg2: memref<1x256x768xbf16, #tpu.memory_space<vmem>>, %arg3: memref<1x256x256xbf16, #tpu.memory_space<vmem>>, %arg4: memref<1x256x1024xbf16, #tpu.memory_space<vmem>>, %arg5: memref<1x512x256xbf16, #tpu.memory_space<vmem>>, %arg6: memref<16x128xf32, #tpu.memory_space<vmem>>, %arg7: memref<16x128xf32, #tpu.memory_space<vmem>>, %arg8: memref<16x16xf32, #tpu.memory_space<vmem>>, %arg9: memref<16x256xf32, #tpu.memory_space<vmem>>) attributes {dimension_semantics = [#tpu.dimension_semantics<arbitrary>], iteration_bounds = array<i64: 2>, scalar_prefetch = 0 : i64, scratch_operands = 0 : i64, tpu.core_type = #tpu.core_type<tc>, window_params = [{pipeline_mode = #tpu.pipeline_mode<synchronous>, transform_indices = @transform_0, window_bounds = array<i64: 16, 256>}, {transform_indices = @transform_1, window_bounds = array<i64: 1, 256, 768>}, {transform_indices = @transform_2, window_bounds = array<i64: 1, 256, 256>}, {transform_indices = @transform_3, window_bounds = array<i64: 1, 256, 1024>}, {transform_indices = @transform_4, window_bounds = array<i64: 1, 512, 256>}, {pipeline_mode = #tpu.pipeline_mode<synchronous>, transform_indices = @transform_5, window_bounds = array<i64: 16, 128>}, {pipeline_mode = #tpu.pipeline_mode<synchronous>, transform_indices = @transform_6, window_bounds = array<i64: 16, 128>}, {pipeline_mode = #tpu.pipeline_mode<synchronous>, transform_indices = @transform_7, window_bounds = array<i64: 16, 16>}, {pipeline_mode = #tpu.pipeline_mode<synchronous>, transform_indices = @transform_8, window_bounds = array<i64: 16, 256>}]} {
    %c0_i32 = arith.constant 0 : i32
    %0 = arith.cmpi eq, %arg0, %c0_i32 : i32
    %1 = arith.extui %0 : i1 to i32
    %c0_i32_0 = arith.constant 0 : i32
    %2 = arith.cmpi ne, %1, %c0_i32_0 : i32
    scf.if %2 {
      %c0_43 = arith.constant 0 : index
      %c0_44 = arith.constant 0 : index
      %112 = vector.load %arg1[%c0_43, %c0_44] : memref<16x256xf32, #tpu.memory_space<vmem>>, vector<16x256xf32>
      %c0_45 = arith.constant 0 : index
      %c0_46 = arith.constant 0 : index
      %113 = vector.load %arg9[%c0_45, %c0_46] : memref<16x256xf32, #tpu.memory_space<vmem>>, vector<16x256xf32>
      tpu.vector_store %arg9[%c0_45, %c0_46], %112 {strides = array<i32>} : memref<16x256xf32, #tpu.memory_space<vmem>>, vector<16x256xf32>,
    } else {
    }
    %c0 = arith.constant 0 : index
    %c0_1 = arith.constant 0 : index
    %3 = vector.load %arg9[%c0, %c0_1] : memref<16x256xf32, #tpu.memory_space<vmem>>, vector<16x256xf32>
    %c0_2 = arith.constant 0 : index
    %c0_3 = arith.constant 0 : index
    %4 = vector.load %arg6[%c0_2, %c0_3] : memref<16x128xf32, #tpu.memory_space<vmem>>, vector<16x128xf32>
    %c0_4 = arith.constant 0 : index
    %c0_5 = arith.constant 0 : index
    %5 = vector.load %arg7[%c0_4, %c0_5] : memref<16x128xf32, #tpu.memory_space<vmem>>, vector<16x128xf32>
    %c0_6 = arith.constant 0 : index
    %c0_7 = arith.constant 0 : index
    %6 = vector.load %arg8[%c0_6, %c0_7] : memref<16x16xf32, #tpu.memory_space<vmem>>, vector<16x16xf32>
    %7 = arith.mulf %3, %3 : vector<16x256xf32>
    %cst = arith.constant dense<0.000000e+00> : vector<16xf32>
    %8 = vector.multi_reduction <add>, %7, %cst [1] : vector<16x256xf32> to vector<16xf32>
    %9 = vector.shape_cast %8 : vector<16xf32> to vector<16x1xf32>
    %cst_8 = arith.constant 2.560000e+02 : f32
    %10 = vector.broadcast %cst_8 : f32 to vector<16x1xf32>
    %11 = arith.divf %9, %10 : vector<16x1xf32>
    %cst_9 = arith.constant 9.99999997E-7 : f32
    %12 = vector.broadcast %cst_9 : f32 to vector<16x1xf32>
    %13 = arith.addf %11, %12 : vector<16x1xf32>
    %14 = math.rsqrt %13 : vector<16x1xf32>
    %15 = vector.broadcast %14 : vector<16x1xf32> to vector<16x256xf32>
    %16 = arith.mulf %3, %15 : vector<16x256xf32>
    %17 = arith.truncf %16 : vector<16x256xf32> to vector<16x256xbf16>
    %c0_10 = arith.constant 0 : index
    %c0_11 = arith.constant 0 : index
    %c0_12 = arith.constant 0 : index
    %18 = vector.load %arg2[%c0_10, %c0_11, %c0_12] : memref<1x256x768xbf16, #tpu.memory_space<vmem>>, vector<1x256x768xbf16>
    %19 = vector.shape_cast %18 : vector<1x256x768xbf16> to vector<256x768xbf16>
    %cst_13 = arith.constant dense<0.000000e+00> : vector<16x768xf32>
    %20 = tpu.matmul %17, %19, %cst_13 {dimension_numbers = #tpu.dot_dimension_numbers<[1], [0], [0], [1], [0, 0, 1, 1], [], []>} : vector<16x256xbf16>, vector<256x768xbf16>, vector<16x768xf32> -> vector<16x768xf32>
    %21 = vector.extract_strided_slice %20 {offsets = [0, 0], sizes = [16, 128], strides = [1, 1]} : vector<16x768xf32> to vector<16x128xf32>
    %22 = vector.extract_strided_slice %20 {offsets = [0, 256], sizes = [16, 128], strides = [1, 1]} : vector<16x768xf32> to vector<16x128xf32>
    %23 = vector.extract_strided_slice %20 {offsets = [0, 512], sizes = [16, 128], strides = [1, 1]} : vector<16x768xf32> to vector<16x128xf32>
    %24 = arith.mulf %21, %4 : vector<16x128xf32>
    %c64_i32 = arith.constant 64 : i32
    %25 = tpu.dynamic_rotate %21 by %c64_i32 dim 1 : vector<16x128xf32>, i32 -> vector<16x128xf32>
    %26 = arith.mulf %25, %5 : vector<16x128xf32>
    %27 = arith.addf %24, %26 : vector<16x128xf32>
    %28 = arith.mulf %22, %4 : vector<16x128xf32>
    %c64_i32_14 = arith.constant 64 : i32
    %29 = tpu.dynamic_rotate %22 by %c64_i32_14 dim 1 : vector<16x128xf32>, i32 -> vector<16x128xf32>
    %30 = arith.mulf %29, %5 : vector<16x128xf32>
    %31 = arith.addf %28, %30 : vector<16x128xf32>
    %32 = arith.truncf %27 : vector<16x128xf32> to vector<16x128xbf16>
    %33 = arith.truncf %31 : vector<16x128xf32> to vector<16x128xbf16>
    %cst_15 = arith.constant dense<0.000000e+00> : vector<16x16xf32>
    %34 = tpu.matmul %32, %33, %cst_15 {dimension_numbers = #tpu.dot_dimension_numbers<[1], [1], [0], [0], [0, 0, 1, 0], [], []>} : vector<16x128xbf16>, vector<16x128xbf16>, vector<16x16xf32> -> vector<16x16xf32>
    %35 = arith.addf %34, %6 : vector<16x16xf32>
    %cst_16 = arith.constant dense<0xFF800000> : vector<16xf32>
    %36 = vector.multi_reduction <maximumf>, %35, %cst_16 [1] : vector<16x16xf32> to vector<16xf32>
    %37 = vector.shape_cast %36 : vector<16xf32> to vector<16x1xf32>
    %38 = vector.broadcast %37 : vector<16x1xf32> to vector<16x16xf32>
    %39 = arith.subf %35, %38 : vector<16x16xf32>
    %40 = math.exp %39 : vector<16x16xf32>
    %cst_17 = arith.constant dense<0.000000e+00> : vector<16xf32>
    %41 = vector.multi_reduction <add>, %40, %cst_17 [1] : vector<16x16xf32> to vector<16xf32>
    %42 = vector.shape_cast %41 : vector<16xf32> to vector<16x1xf32>
    %43 = tpu.reciprocal %42 : vector<16x1xf32> -> vector<16x1xf32>
    %44 = arith.truncf %40 : vector<16x16xf32> to vector<16x16xbf16>
    %45 = arith.truncf %23 : vector<16x128xf32> to vector<16x128xbf16>
    %cst_18 = arith.constant dense<0.000000e+00> : vector<16x128xf32>
    %46 = tpu.matmul %44, %45, %cst_18 {dimension_numbers = #tpu.dot_dimension_numbers<[1], [0], [0], [1], [0, 0, 1, 1], [], []>} : vector<16x16xbf16>, vector<16x128xbf16>, vector<16x128xf32> -> vector<16x128xf32>
    %47 = vector.broadcast %43 : vector<16x1xf32> to vector<16x128xf32>
    %48 = arith.mulf %46, %47 : vector<16x128xf32>
    %49 = vector.extract_strided_slice %20 {offsets = [0, 128], sizes = [16, 128], strides = [1, 1]} : vector<16x768xf32> to vector<16x128xf32>
    %50 = vector.extract_strided_slice %20 {offsets = [0, 384], sizes = [16, 128], strides = [1, 1]} : vector<16x768xf32> to vector<16x128xf32>
    %51 = vector.extract_strided_slice %20 {offsets = [0, 640], sizes = [16, 128], strides = [1, 1]} : vector<16x768xf32> to vector<16x128xf32>
    %52 = arith.mulf %49, %4 : vector<16x128xf32>
    %c64_i32_19 = arith.constant 64 : i32
    %53 = tpu.dynamic_rotate %49 by %c64_i32_19 dim 1 : vector<16x128xf32>, i32 -> vector<16x128xf32>
    %54 = arith.mulf %53, %5 : vector<16x128xf32>
    %55 = arith.addf %52, %54 : vector<16x128xf32>
    %56 = arith.mulf %50, %4 : vector<16x128xf32>
    %c64_i32_20 = arith.constant 64 : i32
    %57 = tpu.dynamic_rotate %50 by %c64_i32_20 dim 1 : vector<16x128xf32>, i32 -> vector<16x128xf32>
    %58 = arith.mulf %57, %5 : vector<16x128xf32>
    %59 = arith.addf %56, %58 : vector<16x128xf32>
    %60 = arith.truncf %55 : vector<16x128xf32> to vector<16x128xbf16>
    %61 = arith.truncf %59 : vector<16x128xf32> to vector<16x128xbf16>
    %cst_21 = arith.constant dense<0.000000e+00> : vector<16x16xf32>
    %62 = tpu.matmul %60, %61, %cst_21 {dimension_numbers = #tpu.dot_dimension_numbers<[1], [1], [0], [0], [0, 0, 1, 0], [], []>} : vector<16x128xbf16>, vector<16x128xbf16>, vector<16x16xf32> -> vector<16x16xf32>
    %63 = arith.addf %62, %6 : vector<16x16xf32>
    %cst_22 = arith.constant dense<0xFF800000> : vector<16xf32>
    %64 = vector.multi_reduction <maximumf>, %63, %cst_22 [1] : vector<16x16xf32> to vector<16xf32>
    %65 = vector.shape_cast %64 : vector<16xf32> to vector<16x1xf32>
    %66 = vector.broadcast %65 : vector<16x1xf32> to vector<16x16xf32>
    %67 = arith.subf %63, %66 : vector<16x16xf32>
    %68 = math.exp %67 : vector<16x16xf32>
    %cst_23 = arith.constant dense<0.000000e+00> : vector<16xf32>
    %69 = vector.multi_reduction <add>, %68, %cst_23 [1] : vector<16x16xf32> to vector<16xf32>
    %70 = vector.shape_cast %69 : vector<16xf32> to vector<16x1xf32>
    %71 = tpu.reciprocal %70 : vector<16x1xf32> -> vector<16x1xf32>
    %72 = arith.truncf %68 : vector<16x16xf32> to vector<16x16xbf16>
    %73 = arith.truncf %51 : vector<16x128xf32> to vector<16x128xbf16>
    %cst_24 = arith.constant dense<0.000000e+00> : vector<16x128xf32>
    %74 = tpu.matmul %72, %73, %cst_24 {dimension_numbers = #tpu.dot_dimension_numbers<[1], [0], [0], [1], [0, 0, 1, 1], [], []>} : vector<16x16xbf16>, vector<16x128xbf16>, vector<16x128xf32> -> vector<16x128xf32>
    %75 = vector.broadcast %71 : vector<16x1xf32> to vector<16x128xf32>
    %76 = arith.mulf %74, %75 : vector<16x128xf32>
    %77 = tpu.concatenate %48, %76 in 1 : vector<16x128xf32>, vector<16x128xf32> -> vector<16x256xf32>
    %78 = arith.truncf %77 : vector<16x256xf32> to vector<16x256xbf16>
    %c0_25 = arith.constant 0 : index
    %c0_26 = arith.constant 0 : index
    %c0_27 = arith.constant 0 : index
    %79 = vector.load %arg3[%c0_25, %c0_26, %c0_27] : memref<1x256x256xbf16, #tpu.memory_space<vmem>>, vector<1x256x256xbf16>
    %80 = vector.shape_cast %79 : vector<1x256x256xbf16> to vector<256x256xbf16>
    %cst_28 = arith.constant dense<0.000000e+00> : vector<16x256xf32>
    %81 = tpu.matmul %78, %80, %cst_28 {dimension_numbers = #tpu.dot_dimension_numbers<[1], [0], [0], [1], [0, 0, 1, 1], [], []>} : vector<16x256xbf16>, vector<256x256xbf16>, vector<16x256xf32> -> vector<16x256xf32>
    %82 = arith.addf %3, %81 : vector<16x256xf32>
    %83 = arith.mulf %82, %82 : vector<16x256xf32>
    %cst_29 = arith.constant dense<0.000000e+00> : vector<16xf32>
    %84 = vector.multi_reduction <add>, %83, %cst_29 [1] : vector<16x256xf32> to vector<16xf32>
    %85 = vector.shape_cast %84 : vector<16xf32> to vector<16x1xf32>
    %cst_30 = arith.constant 2.560000e+02 : f32
    %86 = vector.broadcast %cst_30 : f32 to vector<16x1xf32>
    %87 = arith.divf %85, %86 : vector<16x1xf32>
    %cst_31 = arith.constant 9.99999997E-7 : f32
    %88 = vector.broadcast %cst_31 : f32 to vector<16x1xf32>
    %89 = arith.addf %87, %88 : vector<16x1xf32>
    %90 = math.rsqrt %89 : vector<16x1xf32>
    %91 = vector.broadcast %90 : vector<16x1xf32> to vector<16x256xf32>
    %92 = arith.mulf %82, %91 : vector<16x256xf32>
    %93 = arith.truncf %92 : vector<16x256xf32> to vector<16x256xbf16>
    %c0_32 = arith.constant 0 : index
    %c0_33 = arith.constant 0 : index
    %c0_34 = arith.constant 0 : index
    %94 = vector.load %arg4[%c0_32, %c0_33, %c0_34] : memref<1x256x1024xbf16, #tpu.memory_space<vmem>>, vector<1x256x1024xbf16>
    %95 = vector.shape_cast %94 : vector<1x256x1024xbf16> to vector<256x1024xbf16>
    %cst_35 = arith.constant dense<0.000000e+00> : vector<16x1024xf32>
    %96 = tpu.matmul %93, %95, %cst_35 {dimension_numbers = #tpu.dot_dimension_numbers<[1], [0], [0], [1], [0, 0, 1, 1], [], []>} : vector<16x256xbf16>, vector<256x1024xbf16>, vector<16x1024xf32> -> vector<16x1024xf32>
    %97 = vector.extract_strided_slice %96 {offsets = [0, 0], sizes = [16, 512], strides = [1, 1]} : vector<16x1024xf32> to vector<16x512xf32>
    %98 = vector.extract_strided_slice %96 {offsets = [0, 512], sizes = [16, 512], strides = [1, 1]} : vector<16x1024xf32> to vector<16x512xf32>
    %99 = arith.negf %97 : vector<16x512xf32>
    %100 = math.exp %99 : vector<16x512xf32>
    %cst_36 = arith.constant 1.000000e+00 : f32
    %101 = vector.broadcast %cst_36 : f32 to vector<16x512xf32>
    %102 = arith.addf %101, %100 : vector<16x512xf32>
    %103 = arith.divf %101, %102 : vector<16x512xf32>
    %104 = arith.mulf %97, %103 : vector<16x512xf32>
    %105 = arith.mulf %104, %98 : vector<16x512xf32>
    %106 = arith.truncf %105 : vector<16x512xf32> to vector<16x512xbf16>
    %c0_37 = arith.constant 0 : index
    %c0_38 = arith.constant 0 : index
    %c0_39 = arith.constant 0 : index
    %107 = vector.load %arg5[%c0_37, %c0_38, %c0_39] : memref<1x512x256xbf16, #tpu.memory_space<vmem>>, vector<1x512x256xbf16>
    %108 = vector.shape_cast %107 : vector<1x512x256xbf16> to vector<512x256xbf16>
    %cst_40 = arith.constant dense<0.000000e+00> : vector<16x256xf32>
    %109 = tpu.matmul %106, %108, %cst_40 {dimension_numbers = #tpu.dot_dimension_numbers<[1], [0], [0], [1], [0, 0, 1, 1], [], []>} : vector<16x512xbf16>, vector<512x256xbf16>, vector<16x256xf32> -> vector<16x256xf32>
    %110 = arith.addf %82, %109 : vector<16x256xf32>
    %c0_41 = arith.constant 0 : index
    %c0_42 = arith.constant 0 : index
    %111 = vector.load %arg9[%c0_41, %c0_42] : memref<16x256xf32, #tpu.memory_space<vmem>>, vector<16x256xf32>
    tpu.vector_store %arg9[%c0_41, %c0_42], %110 {strides = array<i32>} : memref<16x256xf32, #tpu.memory_space<vmem>>, vector<16x256xf32>,
    return
  }
  func.func @transform_0(%arg0: i32) -> (i32, i32) {
    %c0_i32 = arith.constant 0 : i32
    %c0_i32_0 = arith.constant 0 : i32
    %c0_i32_1 = arith.constant 0 : i32
    return %c0_i32, %c0_i32_0 : i32, i32
  }
  func.func @transform_1(%arg0: i32) -> (i32, i32, i32) {
    %c0_i32 = arith.constant 0 : i32
    %c0_i32_0 = arith.constant 0 : i32
    %c0_i32_1 = arith.constant 0 : i32
    return %arg0, %c0_i32, %c0_i32_0 : i32, i32, i32
  }
  func.func @transform_2(%arg0: i32) -> (i32, i32, i32) {
    %c0_i32 = arith.constant 0 : i32
    %c0_i32_0 = arith.constant 0 : i32
    %c0_i32_1 = arith.constant 0 : i32
    return %arg0, %c0_i32, %c0_i32_0 : i32, i32, i32
  }
  func.func @transform_3(%arg0: i32) -> (i32, i32, i32) {
    %c0_i32 = arith.constant 0 : i32
    %c0_i32_0 = arith.constant 0 : i32
    %c0_i32_1 = arith.constant 0 : i32
    return %arg0, %c0_i32, %c0_i32_0 : i32, i32, i32
  }
  func.func @transform_4(%arg0: i32) -> (i32, i32, i32) {
    %c0_i32 = arith.constant 0 : i32
    %c0_i32_0 = arith.constant 0 : i32
    %c0_i32_1 = arith.constant 0 : i32
    return %arg0, %c0_i32, %c0_i32_0 : i32, i32, i32
  }
  func.func @transform_5(%arg0: i32) -> (i32, i32) {
    %c0_i32 = arith.constant 0 : i32
    %c0_i32_0 = arith.constant 0 : i32
    %c0_i32_1 = arith.constant 0 : i32
    return %c0_i32, %c0_i32_0 : i32, i32
  }
  func.func @transform_6(%arg0: i32) -> (i32, i32) {
    %c0_i32 = arith.constant 0 : i32
    %c0_i32_0 = arith.constant 0 : i32
    %c0_i32_1 = arith.constant 0 : i32
    return %c0_i32, %c0_i32_0 : i32, i32
  }
  func.func @transform_7(%arg0: i32) -> (i32, i32) {
    %c0_i32 = arith.constant 0 : i32
    %c0_i32_0 = arith.constant 0 : i32
    %c0_i32_1 = arith.constant 0 : i32
    return %c0_i32, %c0_i32_0 : i32, i32
  }
  func.func @transform_8(%arg0: i32) -> (i32, i32) {
    %c0_i32 = arith.constant 0 : i32
    %c0_i32_0 = arith.constant 0 : i32
    %c0_i32_1 = arith.constant 0 : i32
    return %c0_i32, %c0_i32_0 : i32, i32
  }
}

</mosaic_0001>

<bundles_post_ra>
// kernel: abbreviated_llama_fused.1
= control target key start
LH: loop header
LB: loop body
LE: loop exit
PB: predicated region body
PF: predicated region fallthrough
CT: control target
= control target key end

     0   :  { %s5372_s0 = inlined_call_operand.hbm [shape: f32[16,256], index: 0, kind: input, shape index: {}]   ;;  %s5373_s1 = inlined_call_operand.hbm [shape: bf16[2,256,768], index: 1, kind: input, shape index: {}]   ;;  %s5374_s2 = inlined_call_operand.hbm [shape: bf16[2,256,256], index: 2, kind: input, shape index: {}]   ;;  %s5375_s3 = inlined_call_operand.hbm [shape: bf16[2,256,1024], index: 3, kind: input, shape index: {}]   ;;  %s5376_s4 = inlined_call_operand.hbm [shape: bf16[2,512,256], index: 4, kind: input, shape index: {}]   ;;  %s5377_s5 = inlined_call_operand.vmem [shape: f32[16,128], index: 5, kind: input, shape index: {}]   ;;  %s5378_s6 = inlined_call_operand.hbm [shape: f32[16,128], index: 6, kind: input, shape index: {}]   ;;  %s5379_s7 = inlined_call_operand.hbm [shape: f32[16,16], index: 7, kind: input, shape index: {}]   ;;  %s5380_s8 = inlined_call_operand.hbm [shape: f32[16,256], index: 8, kind: output, shape index: {}]  }
   0x1   :  { %5403 = sst [smem:[#allocation24_spill]] %s5373_s1 }
   0x2   :  { %5404 = sst [smem:[#allocation25_spill]] %s5375_s3 }
   0x3   :  { %5405 = sst [smem:[#allocation26_spill]] %s5377_s5 }
   0x4   :  { %5406 = sst [smem:[#allocation27_spill]] %s5378_s6 }
   0x5   :  { %5407 = sst [smem:[#allocation28_spill]] %s5380_s8 }
   0x6   :  { %13 = vsyncpa [#allocation3], 0 }
   0x7   :  { %14 = vsyncpa [#allocation6], 0 }
   0x8   :  { %16 = vsyncpa [#allocation6 + $0x1], 0 }
   0x9   :  { %17 = vsyncpa [#allocation9], 0 }
   0xa   :  { %19 = vsyncpa [#allocation9 + $0x1], 0 }
   0xb   :  { %20 = vsyncpa [#allocation12], 0 }
   0xc   :  { %21 = vsyncpa [#allocation4], 0  ;;  %s4587_s27 = smov 0   ;;  %s4589_s28 = smov 0  }
   0xd   :  { %s4591_s29 = smov 0   ;;  %s4593_s30 = smov 0  }
   0xe LB: > { %5408 = sst [smem:[#allocation20_spill]] %s4515_s29  ;;  %s4606_s9 = sadd.s32 4294967295, %s4519_s30   ;;  %s4519_s30 = sphi %s4593_s30, %s5443_s30   ;;  %s4515_s29 = sphi %s4591_s29, %s5445_s29   ;;  %s4511_s28 = sphi %s4589_s28, %s5447_s28   ;;  %s4507_s27 = sphi %s4587_s27, %s5446_s27  }
   0xf   : > { %s4609_s10 = sadd.s32 1, %s4519_s30   ;;  %s55_s12 = sadd.s32 1, %s4515_s29 }
  0x10   : > { %5409 = sst [smem:[#allocation21_spill]] %s4609_s10  ;;  %s52_s11 = ssub.s32 %s4519_s30, %s4609_s10 }
  0x11   : > { %p53_p0 = scmp.eq.s32.totalorder %s52_s11, 0  ;;  %p62_p1 = scmp.ne.s32.totalorder %s4515_s29, %s4511_s28 }
  0x12   : > { %p63_p2 = scmp.eq.s32.totalorder %s4519_s30, 0  ;;  %p68_p3 = scmp.ne.s32.totalorder %s4511_s28, %s4507_s27 }
  0x13   : > { %s4619_s13 = scalar_select %p53_p0, %s4515_s29, %s55_s12  }
  0x14   : > { %p4621_p4 = por %p63_p2, %p62_p1  ;;  %p5381_p5 = scmp.eq.s32.totalorder %s4606_s9, 0 }
  0x15   : > { %5410 = sst [smem:[#allocation22_spill]] %s4619_s13  ;;  %p3387_p6 = scmp.ge.s32.totalorder %s4519_s30, 1 }
  0x16   : > { %s5411_s14 = scalar_select %p4621_p4, 1, 0 }
  0x17   : > { %p241_p7 = scmp.lt.s32.totalorder %s4519_s30, 3  ;;  %p4630_p8 = por %p5381_p5, %p68_p3 }
  0x18   : > { %s4521_s17 = smov [#allocation11]   ;;  %s4650_s21 = sand.u32 1, %s4515_s29  }
  0x19   : > { %s5412_s15 = scalar_select %p4630_p8, 1, 0 }
  0x1a   : > { %p4635_p10 = pnand %p3387_p6, %p241_p7  ;;  %s269_s18 = sshll.u32 %s4521_s17, 4  ;;  %s270_s18 = int_to_ptr.vmem [resolvable:$true] %s269_s18 }
  0x1b   : > { %5413 = sst [smem:[#allocation23_spill]] %s5412_s15  ;;  %s5416_s6 = sld [smem:[#allocation27_spill]] }
  0x1c   : > { %s5414_s16 = scalar_select %p4635_p10, 1, 0 }
  0x1d   : > { %p3810_p11 = pneg %p4635_p10 }
  0x1f   : > { %p4643_p12 = pnand %p3810_p11, %p5381_p5 }
  0x21   : > { %s5415_s19 = scalar_select %p4643_p12, 1, 0 }
  0x22   : > { %s4239_s24 = scalar_lea.hbm %s5416_s6, 256  ;;  %p4660_p1 = pneg %p4643_p12 }
  0x23   : > { %p4240_p0 = scmp.ne.s32.totalorder %s5416_s6, %s4239_s24  ;;  %p4246_p6 = scmp.lt.u32.totalorder %s4239_s24, %s5416_s6 }
  0x24   : > { %s5417_s27 = scalar_select %p4660_p1, 1, 0 }
  0x25   : > { %p4242_p2 = pnand %p4660_p1, %p4240_p0 }
  0x27   : > { %p4243_p3 = pneg %p4242_p2 }
  0x29   : > { %p4248_p7 = pnand %p4246_p6, %p4243_p3 }
  0x2b   : > { %4251 = shalt.err (!%p4248_p7)
}
  0x2c   : > { %s4252_s17 = scalar_lea.vmem %s270_s18, 256  ;;  %p4260_p13 = scmp.lt.s32.totalorder %s270_s18, %s270_s18 }
  0x2d   : > { %p4253_p11 = scmp.ne.s32.totalorder %s270_s18, %s4252_s17  ;;  %p4261_p8 = scmp.lt.s32.totalorder %s4252_s17, %s4252_s17 }
  0x2f   : > { %p4255_p9 = pnand %p4253_p11, %p4660_p1  ;;  %p4262_p10 = por %p4261_p8, %p4260_p13 }
  0x31   : > { %p4256_p5 = pneg %p4255_p9 }
  0x33   : > { %p4263_p4 = pnand %p4262_p10, %p4256_p5 }
  0x35   : > { %4266 = shalt.err (!%p4263_p4)
}
  0x36   : > { %s5384_s22 = smov 128   ;;  %s5386_s23 = smov 8  }
  0x37   : > { %3816 = dma.hbm_to_vmem [thread:$0]  (!%p4643_p12), %s5416_s6, 256, %s270_s18, [#allocation12], %s5384_s22, %s5384_s22, %s5386_s23  }
  0x38   : > { %s3783_s26 = smul.u32 768, %s4650_s21  ;;  %p5418_p8 = scmp.ne.s32.totalorder %s5411_s14, 0 }
  0x39   : > { %p5419_p5 = scmp.lt.s32.totalorder %s4519_s30, 2  ;;  %s3784_s12 = smul.u32 12288, %s4519_s30 }
  0x3a   : > { %s5421_s1 = sld [smem:[#allocation24_spill]]  ;;  %s300_s24 = scalar_lea.vmem [#allocation5], %s3783_s26 }
  0x3b   : > { %p4684_p4 = pnand %p5419_p5, %p5418_p8  ;;  %s307_s18 = sshll.u32 %s300_s24, 4  ;;  %s4694_s18 = int_to_ptr.vmem [resolvable:$true] %s307_s18 }
  0x3c   : > { %s5422_s14 = sand.u32 1, %s4519_s30  }
  0x3d   : > { %s5420_s11 = scalar_select %p4684_p4, 1, 0 }
  0x3e   : > { %s4698_s25 = scalar_lea.sflag [#allocation6], %s5422_s14  ;;  %p4704_p10 = pneg %p4684_p4 }
  0x40   : > { %s4692_s13 = scalar_lea.hbm %s5421_s1, %s3784_s12  ;;  %s4272_s26 = scalar_lea.hbm %s5421_s1, 24576 }
  0x41   : > { %s4267_s22 = scalar_lea.hbm %s4692_s13, 12288  ;;  %p4273_p2 = scmp.lt.u32.totalorder %s4692_s13, %s5421_s1 }
  0x42   : > { %p4268_p9 = scmp.ne.s32.totalorder %s4692_s13, %s4267_s22  ;;  %p4274_p3 = scmp.lt.u32.totalorder %s4272_s26, %s4267_s22 }
  0x43   : > { %s5423_s23 = scalar_select %p4704_p10, 1, 0 }
  0x44   : > { %p4270_p13 = pnand %p4704_p10, %p4268_p9  ;;  %p4275_p6 = por %p4274_p3, %p4273_p2 }
  0x45   : > { %p4276_p7 = scmp.lt.u32.totalorder %s4267_s22, %s4692_s13 }
  0x46   : > { %p4271_p0 = pneg %p4270_p13 }
  0x47   : > { %p4277_p11 = por %p4276_p7, %p4275_p6 }
  0x49   : > { %p4278_p8 = pnand %p4277_p11, %p4271_p0 }
  0x4b   : > { %4281 = shalt.err (!%p4278_p8)
}
  0x4c   : > { %s4282_s14 = scalar_lea.vmem %s4694_s18, 12288  ;;  %s4524_s20 = smov [#allocation5]  }
  0x4d   : > { %p4283_p5 = scmp.ne.s32.totalorder %s4694_s18, %s4282_s14  ;;  %s4287_s12 = sshll.u32 %s4524_s20, 4  ;;  %s4288_s12 = int_to_ptr.vmem [resolvable:$false] %s4287_s12 }
  0x4e   : > { %s4289_s17 = scalar_lea.vmem %s4288_s12, 24576  ;;  %p4290_p12 = scmp.lt.s32.totalorder %s4694_s18, %s4288_s12 }
  0x4f   : > { %p4285_p9 = pnand %p4283_p5, %p4704_p10  ;;  %p4291_p1 = scmp.lt.s32.totalorder %s4289_s17, %s4282_s14 }
  0x51   : > { %p4286_p13 = pneg %p4285_p9  ;;  %p4292_p2 = por %p4291_p1, %p4290_p12 }
  0x53   : > { %p4293_p3 = pnand %p4292_p2, %p4286_p13 }
  0x55   : > { %4296 = shalt.err (!%p4293_p3)
}
  0x56   : > { %s4525_s22 = smov 384   ;;  %s4526_s26 = smov 24  }
  0x57   : > { %3823 = dma.hbm_to_vmem [thread:$0]  (!%p4684_p4), %s4692_s13, 12288, %s4694_s18, %s4698_s25, %s4525_s22, %s4525_s22, %s4526_s26  }
  0x58   : > { %s3396_s24 = sshll.u32 %s4650_s21, 10  ;;  %s3745_s20 = sshll.u32 %s4519_s30, 14 }
  0x59   : > { %s5424_s3 = sld [smem:[#allocation25_spill]]  ;;  %s342_s17 = scalar_lea.vmem [#allocation8], %s3396_s24 }
  0x5a   : > { %s349_s6 = sshll.u32 %s342_s17, 4  ;;  %s5425_s29 = sand.u32 1, %s4519_s30   ;;  %s4735_s6 = int_to_ptr.vmem [resolvable:$true] %s349_s6 }
  0x5b   : > { %s4739_s10 = scalar_lea.sflag [#allocation9], %s5425_s29 }
  0x5f   : > { %s4733_s14 = scalar_lea.hbm %s5424_s3, %s3745_s20  ;;  %s4302_s18 = scalar_lea.hbm %s5424_s3, 32768 }
  0x60   : > { %s4297_s8 = scalar_lea.hbm %s4733_s14, 16384  ;;  %p4303_p6 = scmp.lt.u32.totalorder %s4733_s14, %s5424_s3 }
  0x61   : > { %p4298_p12 = scmp.ne.s32.totalorder %s4733_s14, %s4297_s8  ;;  %p4304_p7 = scmp.lt.u32.totalorder %s4302_s18, %s4297_s8 }
  0x62   : > { %p4306_p8 = scmp.lt.u32.totalorder %s4297_s8, %s4733_s14 }
  0x63   : > { %p4300_p1 = pnand %p4298_p12, %p4704_p10  ;;  %p4305_p11 = por %p4304_p7, %p4303_p6 }
  0x65   : > { %p4301_p0 = pneg %p4300_p1  ;;  %p4307_p5 = por %p4306_p8, %p4305_p11 }
  0x67   : > { %p4308_p9 = pnand %p4307_p5, %p4301_p0 }
  0x69   : > { %4311 = shalt.err (!%p4308_p9)
}
  0x6a   : > { %s4312_s29 = scalar_lea.vmem %s4735_s6, 16384  ;;  %s4527_s24 = smov [#allocation8]  }
  0x6b   : > { %p4313_p13 = scmp.ne.s32.totalorder %s4735_s6, %s4312_s29  ;;  %s4317_s20 = sshll.u32 %s4527_s24, 4  ;;  %s4318_s20 = int_to_ptr.vmem [resolvable:$false] %s4317_s20 }
  0x6c   : > { %s4319_s12 = scalar_lea.vmem %s4318_s20, 32768  ;;  %p4320_p12 = scmp.lt.s32.totalorder %s4735_s6, %s4318_s20 }
  0x6d   : > { %p4315_p2 = pnand %p4313_p13, %p4704_p10  ;;  %p4321_p1 = scmp.lt.s32.totalorder %s4319_s12, %s4312_s29 }
  0x6f   : > { %p4316_p3 = pneg %p4315_p2  ;;  %p4322_p6 = por %p4321_p1, %p4320_p12 }
  0x71   : > { %p4323_p7 = pnand %p4322_p6, %p4316_p3 }
  0x73   : > { %4326 = shalt.err (!%p4323_p7)
}
  0x74   : > { %s4528_s8 = smov 512   ;;  %s4529_s17 = smov 32  }
  0x75   : > { %3829 = dma.hbm_to_vmem [thread:$0]  (!%p4684_p4), %s4733_s14, 16384, %s4735_s6, %s4739_s10, %s4528_s8, %s4528_s8, %s4529_s17  }
  0x76   : > { %s4530_s13 = smov [#allocation2]   ;;  %s4327_s26 = scalar_lea.hbm %s5372_s0, 512 }
  0x77   : > { %s253_s1 = sshll.u32 %s4530_s13, 4  ;;  %p4328_p0 = scmp.ne.s32.totalorder %s5372_s0, %s4327_s26  ;;  %s254_s1 = int_to_ptr.vmem [resolvable:$true] %s253_s1 }
  0x78   : > { %p5426_p11 = scmp.ne.s32.totalorder %s5417_s27, 0  ;;  %p4334_p9 = scmp.lt.u32.totalorder %s4327_s26, %s5372_s0 }
  0x7a   : > { %p4330_p8 = pnand %p4328_p0, %p5426_p11 }
  0x7c   : > { %p4331_p5 = pneg %p4330_p8 }
  0x7e   : > { %p4336_p13 = pnand %p4334_p9, %p4331_p5 }
  0x80   : > { %4339 = shalt.err (!%p4336_p13)
}
  0x81   : > { %s4340_s6 = scalar_lea.vmem %s254_s1, 512  ;;  %p4348_p1 = scmp.lt.s32.totalorder %s254_s1, %s254_s1 }
  0x82   : > { %p4341_p2 = scmp.ne.s32.totalorder %s254_s1, %s4340_s6  ;;  %p4349_p6 = scmp.lt.s32.totalorder %s4340_s6, %s4340_s6 }
  0x84   : > { %p4343_p3 = pnand %p4341_p2, %p5426_p11  ;;  %p4350_p7 = por %p4349_p6, %p4348_p1 }
  0x86   : > { %p4344_p12 = pneg %p4343_p3 }
  0x88   : > { %p4351_p4 = pnand %p4350_p7, %p4344_p12 }
  0x8a   : > { %4354 = shalt.err (!%p4351_p4)
}
  0x8b   : > { %s4531_s14 = smov 256   ;;  %s4532_s8 = smov 16  }
  0x8c   : > { %p5427_p0 = scmp.ne.s32.totalorder %s5415_s19, 0  ;;  %s3393_s18 = sshll.u32 %s4650_s21, 8 }
  0x8d   : > { %s4533_s22 = smov [#allocation13]   ;;  %s3744_s29 = sshll.u32 %s4519_s30, 12 }
  0x8e   : > { %3813 = dma.hbm_to_vmem [thread:$0]  (!%p5427_p0), %s5372_s0, 512, %s254_s1, [#allocation3], %s4531_s14, %s4531_s14, %s4532_s8  }
  0x8f   : > { %s282_s26 = sshll.u32 %s4533_s22, 4  ;;  %s4355_s12 = scalar_lea.hbm %s5379_s7, 256  ;;  %s283_s26 = int_to_ptr.vmem [resolvable:$true] %s282_s26 }
  0x90   : > { %p4356_p4 = scmp.ne.s32.totalorder %s5379_s7, %s4355_s12  ;;  %p4362_p9 = scmp.lt.u32.totalorder %s4355_s12, %s5379_s7 }
  0x92   : > { %p4358_p8 = pnand %p4356_p4, %p5426_p11 }
  0x94   : > { %p4359_p5 = pneg %p4358_p8 }
  0x96   : > { %p4364_p13 = pnand %p4362_p9, %p4359_p5 }
  0x98   : > { %4367 = shalt.err (!%p4364_p13)
}
  0x99   : > { %s4368_s1 = scalar_lea.vmem %s283_s26, 256  ;;  %p4376_p1 = scmp.lt.s32.totalorder %s283_s26, %s283_s26 }
  0x9a   : > { %p4369_p2 = scmp.ne.s32.totalorder %s283_s26, %s4368_s1  ;;  %p4377_p6 = scmp.lt.s32.totalorder %s4368_s1, %s4368_s1 }
  0x9c   : > { %p4371_p3 = pnand %p4369_p2, %p5426_p11  ;;  %p4378_p7 = por %p4377_p6, %p4376_p1 }
  0x9e   : > { %p4372_p12 = pneg %p4371_p3 }
  0xa0   : > { %p4379_p10 = pnand %p4378_p7, %p4372_p12 }
  0xa2   : > { %4382 = shalt.err (!%p4379_p10)
}
  0xa3   : > { %s5428_s3 = smov 8   ;;  %s5429_s14 = smov 128  }
  0xa4   : > { %3819 = dma.hbm_to_vmem [thread:$0]  (!%p5427_p0), %s5379_s7, 256, %s283_s26, [#allocation12], %s5429_s14, %s5429_s14, %s5428_s3  }
  0xa5   : > { %s4807_s17 = scalar_lea.hbm %s5374_s2, %s3744_s29  ;;  %s321_s13 = scalar_lea.vmem [#allocation7], %s3393_s18 }
  0xa6   : > { %s328_s19 = sshll.u32 %s321_s13, 4  ;;  %s3399_s22 = sshll.u32 %s4650_s21, 9  ;;  %s4809_s19 = int_to_ptr.vmem [resolvable:$true] %s328_s19 }
  0xa7   : > { %s4383_s24 = scalar_lea.hbm %s4807_s17, 4096  ;;  %p5430_p11 = scmp.ne.s32.totalorder %s5423_s23, 0 }
  0xa8   : > { %p4384_p10 = scmp.ne.s32.totalorder %s4807_s17, %s4383_s24  ;;  %s4388_s12 = scalar_lea.hbm %s5374_s2, 8192 }
  0xa9   : > { %p4389_p0 = scmp.lt.u32.totalorder %s4807_s17, %s5374_s2  ;;  %p4390_p5 = scmp.lt.u32.totalorder %s4388_s12, %s4383_s24 }
  0xaa   : > { %p4386_p4 = pnand %p4384_p10, %p5430_p11  ;;  %p4392_p13 = scmp.lt.u32.totalorder %s4383_s24, %s4807_s17 }
  0xab   : > { %p4391_p9 = por %p4390_p5, %p4389_p0 }
  0xac   : > { %p4387_p8 = pneg %p4386_p4 }
  0xad   : > { %p4393_p2 = por %p4392_p13, %p4391_p9 }
  0xaf   : > { %p4394_p3 = pnand %p4393_p2, %p4387_p8 }
  0xb1   : > { %4397 = shalt.err (!%p4394_p3)
}
  0xb2   : > { %s4398_s18 = scalar_lea.vmem %s4809_s19, 4096  ;;  %s4534_s1 = smov [#allocation7]  }
  0xb3   : > { %p4399_p12 = scmp.ne.s32.totalorder %s4809_s19, %s4398_s18  ;;  %s4403_s5 = sshll.u32 %s4534_s1, 4  ;;  %s4404_s5 = int_to_ptr.vmem [resolvable:$false] %s4403_s5 }
  0xb4   : > { %s4405_s15 = scalar_lea.vmem %s4404_s5, 8192  ;;  %p4406_p7 = scmp.lt.s32.totalorder %s4809_s19, %s4404_s5 }
  0xb5   : > { %p4401_p1 = pnand %p4399_p12, %p5430_p11  ;;  %p4407_p10 = scmp.lt.s32.totalorder %s4405_s15, %s4398_s18 }
  0xb7   : > { %p4402_p6 = pneg %p4401_p1  ;;  %p4408_p4 = por %p4407_p10, %p4406_p7 }
  0xb9   : > { %p4409_p0 = pnand %p4408_p4, %p4402_p6 }
  0xbb   : > { %4412 = shalt.err (!%p4409_p0)
}
  0xbc   : > { %p5431_p8 = scmp.ne.s32.totalorder %s5420_s11, 0  ;;  %s3746_s8 = sshll.u32 %s4519_s30, 13 }
  0xbd   : > { %s4841_s24 = scalar_lea.hbm %s5376_s4, %s3746_s8  ;;  %s363_s26 = scalar_lea.vmem [#allocation10], %s3399_s22 }
  0xbe   : > { %3826 = dma.hbm_to_vmem [thread:$0]  (!%p5431_p8), %s4807_s17, 4096, %s4809_s19, %s4698_s25, %s5429_s14, %s5429_s14, %s5428_s3  }
  0xbf   : > { %s370_s20 = sshll.u32 %s363_s26, 4  ;;  %s4413_s12 = scalar_lea.hbm %s4841_s24, 8192  ;;  %s4845_s20 = int_to_ptr.vmem [resolvable:$true] %s370_s20 }
  0xc0   : > { %p4414_p5 = scmp.ne.s32.totalorder %s4841_s24, %s4413_s12  ;;  %s4418_s17 = scalar_lea.hbm %s5376_s4, 16384 }
  0xc1   : > { %p4419_p2 = scmp.lt.u32.totalorder %s4841_s24, %s5376_s4  ;;  %p4420_p3 = scmp.lt.u32.totalorder %s4418_s17, %s4413_s12 }
  0xc2   : > { %p4416_p9 = pnand %p4414_p5, %p5430_p11  ;;  %p4422_p1 = scmp.lt.u32.totalorder %s4413_s12, %s4841_s24 }
  0xc3   : > { %p4421_p12 = por %p4420_p3, %p4419_p2 }
  0xc4   : > { %p4417_p13 = pneg %p4416_p9 }
  0xc5   : > { %p4423_p6 = por %p4422_p1, %p4421_p12 }
  0xc7   : > { %p4424_p7 = pnand %p4423_p6, %p4417_p13 }
  0xc9   : > { %4427 = shalt.err (!%p4424_p7)
}
  0xca   : > { %s4428_s21 = scalar_lea.vmem %s4845_s20, 8192  ;;  %s4535_s22 = smov [#allocation10]  }
  0xcb   : > { %p4429_p10 = scmp.ne.s32.totalorder %s4845_s20, %s4428_s21  ;;  %s4433_s6 = sshll.u32 %s4535_s22, 4  ;;  %s4434_s6 = int_to_ptr.vmem [resolvable:$false] %s4433_s6 }
  0xcc   : > { %s4435_s18 = scalar_lea.vmem %s4434_s6, 16384  ;;  %p4436_p5 = scmp.lt.s32.totalorder %s4845_s20, %s4434_s6 }
  0xcd   : > { %p4431_p4 = pnand %p4429_p10, %p5430_p11  ;;  %p4437_p9 = scmp.lt.s32.totalorder %s4435_s18, %s4428_s21 }
  0xcf   : > { %p4432_p0 = pneg %p4431_p4  ;;  %p4438_p2 = por %p4437_p9, %p4436_p5 }
  0xd1   : > { %p4439_p3 = pnand %p4438_p2, %p4432_p0 }
  0xd3   : > { %4442 = shalt.err (!%p4439_p3)
}
  0xd4   : > { %3832 = dma.hbm_to_vmem [thread:$0]  (!%p5431_p8), %s4841_s24, 8192, %s4845_s20, %s4739_s10, %s5429_s14, %s5429_s14, %s5428_s3  }
  0xd5   : > { %p5432_p11 = scmp.ne.s32.totalorder %s5414_s16, 0 }
  0xd6   : > { %p5433_p13 = scmp.eq.s32.totalorder (!%p5432_p11), %s4606_s9, 0 }
  0xd7   : > { %382 = sbr.rel (%p5432_p11) target bundleno = 2400 (0x960), region = 52 }
  0xde   : > { %4486 = dma.done.wait (%p5433_p13), [#allocation3], 512   ;;  %p5434_p12 = pmov %p5433_p13 }
  0xdf   : > { %s5435_s23 = sld [smem:[#allocation23_spill]]  ;;  %s388_s11 = sand.u32 1, %s4606_s9  }
  0xe0   : > { %4488 = vsyncadd (%p5434_p12), [#allocation3], 4294966784  ;;  %s390_s1 = sand.u32 1, %s4511_s28   ;;  %s389_s15 = scalar_lea.sflag [#allocation6], %s388_s11 }
  0xe1   : > { %s3785_s5 = smul.u32 768, %s390_s1 }
  0xe3   : > { %s4880_s8 = scalar_lea.vmem [#allocation5], %s3785_s5 }
  0xe5   : > { %p5436_p1 = scmp.ne.s32.totalorder %s5435_s23, 0 }
  0xe7   : > { %4490 = dma.done.wait (%p5436_p1), %s389_s15, 16384  }
  0xe8   : > { %4492 = vsyncadd (%p5436_p1), %s389_s15, 4294950912  ;;  %s3404_s10 = sshll.u32 %s390_s1, 8  ;;  %s3405_s16 = sshll.u32 %s390_s1, 10 }
  0xe9   : > { %s4886_s3 = scalar_lea.vmem [#allocation7], %s3404_s10  ;;  %s407_s14 = scalar_lea.sflag [#allocation9], %s388_s11 }
  0xea   : > { %s4888_s27 = scalar_lea.vmem [#allocation8], %s3405_s16 }
  0xeb   : > { %4494 = dma.done.wait (%p5436_p1), %s407_s14, 24576  }
  0xec   : > { %4496 = vsyncadd (%p5436_p1), %s407_s14, 4294942720  ;;  %s3406_s13 = sshll.u32 %s390_s1, 9  ;;  %p5437_p8 = pmov %p5434_p12 }
  0xed   : > { %s4894_s24 = scalar_lea.vmem [#allocation10], %s3406_s13 }
  0xee   : > { %4498 = dma.done.wait (%p5437_p8), [#allocation12], 512   ;;  %p5438_p6 = pmov %p5437_p8 }
  0xef   : > { %p5439_p7 = scmp.ne.s32.totalorder %s4606_s9, 0 }
  0xf0   : > { %4500 = vsyncadd (%p5438_p6), [#allocation12], 4294966784  ;;  %v475_v0 = vld [vmem:[#allocation2] sm:$0xff] (!%p5439_p7)  ;;  %v476_v1 = vld [vmem:[#allocation2 + $0x8] sm:$0xff] (!%p5439_p7) }
  0xf1   : > { %474 = sbr.rel (%p5439_p7) target bundleno = 248 (0xf8), region = 84  ;;  %v477_v2 = vld [vmem:[#allocation2 + $0x10] sm:$0xff] (!%p5439_p7)  ;;  %479 = vst [vmem:[#allocation14] sm:$0xff] (!%p5439_p7), %v475_v0  ;;  %480 = vst [vmem:[#allocation14 + $0x8] sm:$0xff] (!%p5439_p7), %v476_v1  ;;  %v478_v3 = vld [vmem:[#allocation2 + $0x18] sm:$0xff] (!%p5439_p7) }
  0xf2   : > { %481 = vst [vmem:[#allocation14 + $0x10] sm:$0xff] (!%p5439_p7), %v477_v2  ;;  %482 = vst [vmem:[#allocation14 + $0x18] sm:$0xff] (!%p5439_p7), %v478_v3 }
  0xf8 PF: > { %v4902_v4 = vld [vmem:[#allocation14] sm:$0xff]  ;;  %v4904_v5 = vld [vmem:[#allocation14 + $0x8] sm:$0xff]  ;;  %s4536_s26 = smov 64   ;;  %vm4538_vm0 = vmmov 0   ;;  %s5440_s30 = sld [smem:[#allocation26_spill]]  ;;  %vm1284_vm1 = vcmask 130048  }
  0xf9   : > { %v4906_v6 = vld [vmem:[#allocation14 + $0x10] sm:$0xff]  ;;  %v493_v7 = vmul.f32 %v4902_v4, %v4902_v4  ;;  %v494_v8 = vmul.f32 %v4904_v5, %v4904_v5  ;;  %v4912_v9 = vld [vmem:[#allocation14 + $0x18] sm:$0xff]  ;;  %s4539_s29 = smov [#allocation14]   ;;  %p3840_p10 = scmp.eq.s32.totalorder %s4606_s9, 1 }
  0xfa   : > { %v495_v10 = vmul.f32 %v4906_v6, %v4906_v6  ;;  %v496_v11 = vmul.f32 %v4912_v9, %v4912_v9  ;;  %v3891_v12 = vld [vmem:[%s4880_s8 + $0x4] ss:$24 sps:$4 sm:$0xff]   ;;  %v3893_v13 = vld [vmem:[%s4880_s8] ss:$24 sps:$4 sm:$0xff]   ;;  %v3894_v15 = vld [vmem:[%s4880_s8 + $0x14] ss:$24 sps:$4 sm:$0xff]  }
  0xfb   : > { %v497_v14 = vadd.f32 %v494_v8, %v493_v7  ;;  %v3896_v16 = vld [vmem:[%s4880_s8 + $0x10] ss:$24 sps:$4 sm:$0xff]   ;;  %1092 = vmatprep.subr.bf16.mxu1 %v3891_v12  ;;  %v3897_v17 = vld [vmem:[%s4880_s8 + $0x34] ss:$24 sps:$4 sm:$0xff]   ;;  %1178 = vmatprep.subr.bf16.mxu0 %v3894_v15  ;;  %v3900_v20 = vld [vmem:[%s4880_s8 + $0x44] ss:$24 sps:$4 sm:$0xff]  }
  0xfc   : > { %v500_v18 = vadd.f32 %v496_v11, %v495_v10  ;;  %1093 = vmatpush1.bf16.msra.mxu1 %v3893_v13  ;;  %v3899_v19 = vld [vmem:[%s4880_s8 + $0x30] ss:$24 sps:$4 sm:$0xff]   ;;  %1179 = vmatpush1.bf16.msra.mxu0 %v3896_v16  ;;  %v3902_v21 = vld [vmem:[%s4880_s8 + $0x40] ss:$24 sps:$4 sm:$0xff]   ;;  %v3903_v22 = vld [vmem:[%s4880_s8 + $0x64] ss:$24 sps:$4 sm:$0xff]  }
  0xfd   : > { %498 = vadd.xlane.f32.xlu0 %v497_v14  ;;  %1094 = vmatprep.subr.bf16.mxu1 %v3897_v17  ;;  %v3906_v23 = vld [vmem:[%s4880_s8 + $0x74] ss:$24 sps:$4 sm:$0xff]   ;;  %v3905_v24 = vld [vmem:[%s4880_s8 + $0x60] ss:$24 sps:$4 sm:$0xff]   ;;  %v3908_v26 = vld [vmem:[%s4880_s8 + $0x70] ss:$24 sps:$4 sm:$0xff]  }
  0xfe   : > { %1180 = vmatprep.subr.bf16.mxu0 %v3900_v20  ;;  %v3909_v25 = vld [vmem:[%s4880_s8 + $0x94] ss:$24 sps:$4 sm:$0xff]   ;;  %v3912_v27 = vld [vmem:[%s4880_s8 + $0xa4] ss:$24 sps:$4 sm:$0xff]   ;;  %v3911_v28 = vld [vmem:[%s4880_s8 + $0x90] ss:$24 sps:$4 sm:$0xff]   ;;  %s5441_s25 = smov %s5440_s30 }
  0xff   : > { %v3915_v29 = vld [vmem:[%s4880_s8 + $0xc4] ss:$24 sps:$4 sm:$0xff]   ;;  %v3914_v30 = vld [vmem:[%s4880_s8 + $0xa0] ss:$24 sps:$4 sm:$0xff]   ;;  %v3918_v31 = vld [vmem:[%s4880_s8 + $0xd4] ss:$24 sps:$4 sm:$0xff]  }
 0x100   : > { %1095 = vmatpush1.bf16.msra.mxu1 %v3899_v19  ;;  %1181 = vmatpush1.bf16.msra.mxu0 %v3902_v21  ;;  %v3917_v32 = vld [vmem:[%s4880_s8 + $0xc0] ss:$24 sps:$4 sm:$0xff]   ;;  %v3921_v33 = vld [vmem:[%s4880_s8 + $0xf4] ss:$24 sps:$4 sm:$0xff]   ;;  %v3920_v34 = vld [vmem:[%s4880_s8 + $0xd0] ss:$24 sps:$4 sm:$0xff]  }
 0x101   : > { %501 = vadd.xlane.f32.xlu0 %v500_v18  ;;  %1096 = vmatprep.subr.bf16.mxu1 %v3903_v22  ;;  %v3924_v35 = vld [vmem:[%s4880_s8 + $0x104] ss:$24 sps:$4 sm:$0xff]   ;;  %v3923_v36 = vld [vmem:[%s4880_s8 + $0xf0] ss:$24 sps:$4 sm:$0xff]   ;;  %v3926_v38 = vld [vmem:[%s4880_s8 + $0x100] ss:$24 sps:$4 sm:$0xff]  }
 0x102   : > { %1182 = vmatprep.subr.bf16.mxu0 %v3906_v23  ;;  %v3927_v37 = vld [vmem:[%s4880_s8 + $0x124] ss:$24 sps:$4 sm:$0xff]   ;;  %v3930_v39 = vld [vmem:[%s4880_s8 + $0x134] ss:$24 sps:$4 sm:$0xff]   ;;  %v3929_v40 = vld [vmem:[%s4880_s8 + $0x120] ss:$24 sps:$4 sm:$0xff]  }
 0x103   : > { %v3933_v41 = vld [vmem:[%s4880_s8 + $0x154] ss:$24 sps:$4 sm:$0xff]   ;;  %v3932_v42 = vld [vmem:[%s4880_s8 + $0x130] ss:$24 sps:$4 sm:$0xff]   ;;  %v3936_v43 = vld [vmem:[%s4880_s8 + $0x164] ss:$24 sps:$4 sm:$0xff]  }
 0x104   : > { %1097 = vmatpush1.bf16.msra.mxu1 %v3905_v24  ;;  %1183 = vmatpush1.bf16.msra.mxu0 %v3908_v26  ;;  %v3935_v44 = vld [vmem:[%s4880_s8 + $0x150] ss:$24 sps:$4 sm:$0xff]   ;;  %v3939_v45 = vld [vmem:[%s4880_s8 + $0x184] ss:$24 sps:$4 sm:$0xff]   ;;  %v3938_v46 = vld [vmem:[%s4880_s8 + $0x160] ss:$24 sps:$4 sm:$0xff]  }
 0x105   : > { %1098 = vmatprep.subr.bf16.mxu1 %v3909_v25  ;;  %1184 = vmatprep.subr.bf16.mxu0 %v3912_v27  ;;  %v3942_v47 = vld [vmem:[%s4880_s8 + $0x194] ss:$24 sps:$4 sm:$0xff]   ;;  %v3941_v48 = vld [vmem:[%s4880_s8 + $0x180] ss:$24 sps:$4 sm:$0xff]   ;;  %v3944_v50 = vld [vmem:[%s4880_s8 + $0x190] ss:$24 sps:$4 sm:$0xff]  }
 0x106   : > { %v3945_v49 = vld [vmem:[%s4880_s8 + $0x1b4] ss:$24 sps:$4 sm:$0xff]   ;;  %v3948_v51 = vld [vmem:[%s4880_s8 + $0x1c4] ss:$24 sps:$4 sm:$0xff]   ;;  %v3947_v52 = vld [vmem:[%s4880_s8 + $0x1b0] ss:$24 sps:$4 sm:$0xff]  }
 0x107   : > { %v3951_v53 = vld [vmem:[%s4880_s8 + $0x1e4] ss:$24 sps:$4 sm:$0xff]   ;;  %v3950_v54 = vld [vmem:[%s4880_s8 + $0x1c0] ss:$24 sps:$4 sm:$0xff]   ;;  %v3954_v55 = vld [vmem:[%s4880_s8 + $0x1f4] ss:$24 sps:$4 sm:$0xff]  }
 0x108   : > { %1099 = vmatpush1.bf16.msra.mxu1 %v3911_v28  ;;  %1185 = vmatpush1.bf16.msra.mxu0 %v3914_v30  ;;  %v3953_v56 = vld [vmem:[%s4880_s8 + $0x1e0] ss:$24 sps:$4 sm:$0xff]   ;;  %v3957_v57 = vld [vmem:[%s4880_s8 + $0x214] ss:$24 sps:$4 sm:$0xff]   ;;  %v3956_v58 = vld [vmem:[%s4880_s8 + $0x1f0] ss:$24 sps:$4 sm:$0xff]  }
 0x109   : > { %1100 = vmatprep.subr.bf16.mxu1 %v3915_v29  ;;  %1186 = vmatprep.subr.bf16.mxu0 %v3918_v31  ;;  %v3960_v59 = vld [vmem:[%s4880_s8 + $0x224] ss:$24 sps:$4 sm:$0xff]   ;;  %v3959_v60 = vld [vmem:[%s4880_s8 + $0x210] ss:$24 sps:$4 sm:$0xff]   ;;  %v3962_v61 = vld [vmem:[%s4880_s8 + $0x220] ss:$24 sps:$4 sm:$0xff]  }
 0x10a   : > { %v3963_v62 = vld [vmem:[%s4880_s8 + $0x244] ss:$24 sps:$4 sm:$0xff]   ;;  %v3965_v63 = vld [vmem:[%s4880_s8 + $0x240] ss:$24 sps:$4 sm:$0xff]   ;;  %v3966_v0 = vld [vmem:[%s4880_s8 + $0x254] ss:$24 sps:$4 sm:$0xff]  }
 0x10b   : > { %v3969_v1 = vld [vmem:[%s4880_s8 + $0x274] ss:$24 sps:$4 sm:$0xff]   ;;  %v3968_v2 = vld [vmem:[%s4880_s8 + $0x250] ss:$24 sps:$4 sm:$0xff]   ;;  %v3972_v7 = vld [vmem:[%s4880_s8 + $0x284] ss:$24 sps:$4 sm:$0xff]  }
 0x10c   : > { %1101 = vmatpush1.bf16.msra.mxu1 %v3917_v32  ;;  %1187 = vmatpush1.bf16.msra.mxu0 %v3920_v34  ;;  %v3971_v3 = vld [vmem:[%s4880_s8 + $0x270] ss:$24 sps:$4 sm:$0xff]   ;;  %v3975_v8 = vld [vmem:[%s4880_s8 + $0x2a4] ss:$24 sps:$4 sm:$0xff]   ;;  %v3974_v10 = vld [vmem:[%s4880_s8 + $0x280] ss:$24 sps:$4 sm:$0xff]  }
 0x10d   : > { %1102 = vmatprep.subr.bf16.mxu1 %v3921_v33  ;;  %1188 = vmatprep.subr.bf16.mxu0 %v3924_v35  ;;  %v3977_v11 = vld [vmem:[%s4880_s8 + $0x2a0] ss:$24 sps:$4 sm:$0xff]   ;;  %v3978_v12 = vld [vmem:[%s4880_s8 + $0x2b4] ss:$24 sps:$4 sm:$0xff]   ;;  %v3980_v14 = vld [vmem:[%s4880_s8 + $0x2b0] ss:$24 sps:$4 sm:$0xff]  }
 0x10e   : > { %v3981_v13 = vld [vmem:[%s4880_s8 + $0x2d4] ss:$24 sps:$4 sm:$0xff]   ;;  %v3983_v15 = vld [vmem:[%s4880_s8 + $0x2d0] ss:$24 sps:$4 sm:$0xff]   ;;  %v3984_v16 = vld [vmem:[%s4880_s8 + $0x2e4] ss:$24 sps:$4 sm:$0xff]  }
 0x10f   : > { %v3989_v17 = vld [vmem:[%s4880_s8 + $0xc] ss:$24 sps:$4 sm:$0xff]   ;;  %v3986_v18 = vld [vmem:[%s4880_s8 + $0x2e0] ss:$24 sps:$4 sm:$0xff]   ;;  %v3992_v34 = vld [vmem:[%s4880_s8 + $0x3c] ss:$24 sps:$4 sm:$0xff]  }
 0x110   : > { %1103 = vmatpush1.bf16.msra.mxu1 %v3923_v36  ;;  %1189 = vmatpush1.bf16.msra.mxu0 %v3926_v38  ;;  %v3987_v32 = vld [vmem:[%s4880_s8 + $0x8] ss:$24 sps:$4 sm:$0xff]   ;;  %v3996_v35 = vld [vmem:[%s4880_s8 + $0x98] ss:$24 sps:$4 sm:$0xff]   ;;  %v4001_v36 = vld [vmem:[%s4880_s8 + $0xcc] ss:$24 sps:$4 sm:$0xff]  }
 0x111   : > { %1104 = vmatprep.subr.bf16.mxu1 %v3927_v37  ;;  %1190 = vmatprep.subr.bf16.mxu0 %v3930_v39  ;;  %v3999_v37 = vld [vmem:[%s4880_s8 + $0xc8] ss:$24 sps:$4 sm:$0xff]   ;;  %v4004_v38 = vld [vmem:[%s4880_s8 + $0xfc] ss:$24 sps:$4 sm:$0xff]   ;;  %v4002_v39 = vld [vmem:[%s4880_s8 + $0xf8] ss:$24 sps:$4 sm:$0xff]  }
 0x112   : > { %s3239_s21 = sshll.u32 %s4539_s29, 4  ;;  %s3240_s21 = int_to_ptr.vmem [resolvable:$true] %s3239_s21 }
 0x113   : > { %s4443_s22 = scalar_lea.vmem %s3240_s21, 512  ;;  %p4450_p9 = scmp.lt.s32.totalorder %s3240_s21, %s3240_s21 }
 0x114   : > { %1105 = vmatpush1.bf16.msra.mxu1 %v3929_v40  ;;  %1191 = vmatpush1.bf16.msra.mxu0 %v3932_v42  ;;  %v4007_v40 = vld [vmem:[%s4880_s8 + $0x12c] ss:$24 sps:$4 sm:$0xff]   ;;  %v4010_v42 = vld [vmem:[%s4880_s8 + $0x15c] ss:$24 sps:$4 sm:$0xff]   ;;  %p4444_p4 = scmp.ne.s32.totalorder %s3240_s21, %s4443_s22  ;;  %p4451_p2 = scmp.lt.s32.totalorder %s4443_s22, %s4443_s22 }
 0x115   : > { %1106 = vmatprep.subr.bf16.mxu1 %v3933_v41  ;;  %1192 = vmatprep.subr.bf16.mxu0 %v3936_v43  ;;  %v4005_v41 = vld [vmem:[%s4880_s8 + $0x128] ss:$24 sps:$4 sm:$0xff]   ;;  %v4008_v43 = vld [vmem:[%s4880_s8 + $0x158] ss:$24 sps:$4 sm:$0xff]  }
 0x116   : > { %p4445_p0 = pnand %p4444_p4, %p3840_p10  ;;  %p4452_p3 = por %p4451_p2, %p4450_p9 }
 0x118   : > { %1107 = vmatpush1.bf16.msra.mxu1 %v3935_v44  ;;  %1193 = vmatpush1.bf16.msra.mxu0 %v3938_v46  ;;  %v4013_v44 = vld [vmem:[%s4880_s8 + $0x18c] ss:$24 sps:$4 sm:$0xff]   ;;  %v4016_v46 = vld [vmem:[%s4880_s8 + $0x1bc] ss:$24 sps:$4 sm:$0xff]   ;;  %p4446_p5 = pneg %p4445_p0 }
 0x119   : > { %1108 = vmatprep.subr.bf16.mxu1 %v3939_v45  ;;  %1194 = vmatprep.subr.bf16.mxu0 %v3942_v47  ;;  %v4011_v45 = vld [vmem:[%s4880_s8 + $0x188] ss:$24 sps:$4 sm:$0xff]   ;;  %v4014_v47 = vld [vmem:[%s4880_s8 + $0x1b8] ss:$24 sps:$4 sm:$0xff]  }
 0x11a   : > { %p4453_p11 = pnand %p4452_p3, %p4446_p5 }
 0x11c   : > { %1109 = vmatpush1.bf16.msra.mxu1 %v3941_v48  ;;  %1195 = vmatpush1.bf16.msra.mxu0 %v3944_v50  ;;  %v4019_v48 = vld [vmem:[%s4880_s8 + $0x1ec] ss:$24 sps:$4 sm:$0xff]   ;;  %v4022_v50 = vld [vmem:[%s4880_s8 + $0x21c] ss:$24 sps:$4 sm:$0xff]  }
 0x11d   : > { %1110 = vmatprep.subr.bf16.mxu1 %v3945_v49  ;;  %1196 = vmatprep.subr.bf16.mxu0 %v3948_v51  ;;  %v4017_v49 = vld [vmem:[%s4880_s8 + $0x1e8] ss:$24 sps:$4 sm:$0xff]   ;;  %v4020_v51 = vld [vmem:[%s4880_s8 + $0x218] ss:$24 sps:$4 sm:$0xff]  }
 0x120   : > { %1111 = vmatpush1.bf16.msra.mxu1 %v3947_v52  ;;  %1197 = vmatpush1.bf16.msra.mxu0 %v3950_v54  ;;  %v4025_v52 = vld [vmem:[%s4880_s8 + $0x24c] ss:$24 sps:$4 sm:$0xff]   ;;  %v4028_v54 = vld [vmem:[%s4880_s8 + $0x27c] ss:$24 sps:$4 sm:$0xff]  }
 0x121   : > { %1112 = vmatprep.subr.bf16.mxu1 %v3951_v53  ;;  %1198 = vmatprep.subr.bf16.mxu0 %v3954_v55  ;;  %v4023_v53 = vld [vmem:[%s4880_s8 + $0x248] ss:$24 sps:$4 sm:$0xff]   ;;  %v4026_v55 = vld [vmem:[%s4880_s8 + $0x278] ss:$24 sps:$4 sm:$0xff]  }
 0x124   : > { %1113 = vmatpush1.bf16.msra.mxu1 %v3953_v56  ;;  %1199 = vmatpush1.bf16.msra.mxu0 %v3956_v58  ;;  %v4031_v56 = vld [vmem:[%s4880_s8 + $0x2ac] ss:$24 sps:$4 sm:$0xff]   ;;  %v4034_v58 = vld [vmem:[%s4880_s8 + $0x2dc] ss:$24 sps:$4 sm:$0xff]  }
 0x125   : > { %1114 = vmatprep.subr.bf16.mxu1 %v3957_v57  ;;  %1200 = vmatprep.subr.bf16.mxu0 %v3960_v59  ;;  %v4029_v57 = vld [vmem:[%s4880_s8 + $0x2a8] ss:$24 sps:$4 sm:$0xff]   ;;  %v4032_v59 = vld [vmem:[%s4880_s8 + $0x2d8] ss:$24 sps:$4 sm:$0xff]  }
 0x128   : > { %1115 = vmatpush1.bf16.msra.mxu1 %v3959_v60  ;;  %1201 = vmatpush1.bf16.msra.mxu0 %v3962_v61 }
 0x129   : > { %1116 = vmatprep.subr.bf16.mxu1 %v3963_v62  ;;  %1202 = vmatprep.subr.bf16.mxu0 %v3966_v0 }
 0x12c   : > { %1117 = vmatpush1.bf16.msra.mxu1 %v3965_v63  ;;  %1203 = vmatpush1.bf16.msra.mxu0 %v3968_v2 }
 0x12d   : > { %1118 = vmatprep.subr.bf16.mxu1 %v3969_v1  ;;  %1204 = vmatprep.subr.bf16.mxu0 %v3972_v7 }
 0x130   : > { %1119 = vmatpush1.bf16.msra.mxu1 %v3971_v3  ;;  %1205 = vmatpush1.bf16.msra.mxu0 %v3974_v10  ;;  %v4537_v10 = vmov 0.0  }
 0x131   : > { %1120 = vmatprep.subr.bf16.mxu1 %v3975_v8  ;;  %1206 = vmatprep.subr.bf16.mxu0 %v3978_v12 }
 0x134   : > { %1121 = vmatpush1.bf16.msra.mxu1 %v3977_v11  ;;  %1207 = vmatpush1.bf16.msra.mxu0 %v3980_v14 }
 0x135   : > { %1122 = vmatprep.subr.bf16.mxu1 %v3981_v13  ;;  %1208 = vmatprep.subr.bf16.mxu0 %v3984_v16 }
 0x138   : > { %1123 = vmatpush1.bf16.msra.mxu1 %v3983_v15  ;;  %1209 = vmatpush1.bf16.msra.mxu0 %v3986_v18  ;;  %v489_v15 = vld [vmem:[#allocation11] sm:$0xff]  ;;  %v488_v18 = vld [vmem:[%s5441_s25 + $0x8] sm:$0xff] }
 0x139   : > { %1135 = vmatprep.subr.bf16.mxu1 %v3989_v17  ;;  %3755 = vmatprep.subr.bf16.mxu0 %v4537_v10  ;;  %v487_v17 = vld [vmem:[%s5440_s30] sm:$0xff] }
 0x18a   : > { %v499_v19 = vpop.xlane.xlu0 %498 }
 0x18b   : > { %v504_v20 = vmul.f32 0.00390625, %v499_v19  ;;  %v490_v19 = vld [vmem:[#allocation11 + $0x8] sm:$0xff] }
 0x18d   : > { %v506_v21 = vadd.f32 1e-06, %v504_v20 }
 0x18e   : > { %v502_v22 = vpop.xlane.xlu0 %501 }
 0x18f   : > { %v505_v23 = vmul.f32 0.00390625, %v502_v22  ;;  %4179 = vrsqrt.f32 %v506_v21 }
 0x191   : > { %v507_v24 = vadd.f32 1e-06, %v505_v23 }
 0x193   : > { %4181 = vrsqrt.f32 %v507_v24 }
 0x199   : > { %v4180_v25 = vpop.eup %4179 }
 0x19a   : > { %v511_v27 = vmul.f32 %v4180_v25, %v4904_v5  ;;  %v510_v29 = vmul.f32 %v4180_v25, %v4902_v4  ;;  %v3990_v4 = vld [vmem:[%s4880_s8 + $0x38] ss:$24 sps:$4 sm:$0xff]   ;;  %v3995_v5 = vld [vmem:[%s4880_s8 + $0x6c] ss:$24 sps:$4 sm:$0xff]  }
 0x19d   : > { %v4182_v26 = vpop.eup %4181 }
 0x19e   : > { %v513_v28 = vmul.f32 %v4182_v26, %v4912_v9  ;;  %v512_v30 = vmul.f32 %v4182_v26, %v4906_v6  ;;  %v3993_v6 = vld [vmem:[%s4880_s8 + $0x68] ss:$24 sps:$4 sm:$0xff]   ;;  %v3998_v9 = vld [vmem:[%s4880_s8 + $0x9c] ss:$24 sps:$4 sm:$0xff]  }
 0x1a0   : > { %v515_v31 = vpack.c.bf16 %v513_v28, %v511_v27  ;;  %v4988_v33 = vpack.c.bf16 %v512_v30, %v510_v29 }
 0x1a2   : > { %1124 = vmatprep.mubr.bf16.mxu1 %v515_v31  ;;  %1210 = vmatprep.mubr.bf16.mxu0 %v515_v31 }
 0x1a3   : > { %1125 = vmatmul.mubr.bf16.vlgmr.msra.gmra.mrb[0].mxu1 %v4988_v33  ;;  %1211 = vmatmul.mubr.bf16.vlgmr.msra.gmra.mrb[0].mxu0 %v4988_v33 }
 0x1a4   : > { %1136 = vmatpush1.bf16.msra.mxu1 %v3987_v32  ;;  %1167 = vmatprep.mubr.bf16.mxu1 %v515_v31 }
 0x1a5   : > { %1137 = vmatprep.subr.bf16.mxu1 %v3992_v34  ;;  %3757 = vmatprep.mubr.msk.bf16.mxu0 %vm4538_vm0, %v4537_v10 }
 0x1a8   : > { %1138 = vmatpush1.bf16.msra.mxu1 %v3990_v4 }
 0x1a9   : > { %1139 = vmatprep.subr.bf16.mxu1 %v3995_v5 }
 0x1ac   : > { %1140 = vmatpush1.bf16.msra.mxu1 %v3993_v6 }
 0x1ad   : > { %1141 = vmatprep.subr.bf16.mxu1 %v3998_v9 }
 0x1b0   : > { %1142 = vmatpush1.bf16.msra.mxu1 %v3996_v35 }
 0x1b1   : > { %1143 = vmatprep.subr.bf16.mxu1 %v4001_v36 }
 0x1b4   : > { %1144 = vmatpush1.bf16.msra.mxu1 %v3999_v37 }
 0x1b5   : > { %1145 = vmatprep.subr.bf16.mxu1 %v4004_v38 }
 0x1b8   : > { %1146 = vmatpush1.bf16.msra.mxu1 %v4002_v39 }
 0x1b9   : > { %1147 = vmatprep.subr.bf16.mxu1 %v4007_v40 }
 0x1bc   : > { %1148 = vmatpush1.bf16.msra.mxu1 %v4005_v41 }
 0x1bd   : > { %1149 = vmatprep.subr.bf16.mxu1 %v4010_v42 }
 0x1c0   : > { %1150 = vmatpush1.bf16.msra.mxu1 %v4008_v43 }
 0x1c1   : > { %1151 = vmatprep.subr.bf16.mxu1 %v4013_v44 }
 0x1c4   : > { %1152 = vmatpush1.bf16.msra.mxu1 %v4011_v45 }
 0x1c5   : > { %1153 = vmatprep.subr.bf16.mxu1 %v4016_v46 }
 0x1c8   : > { %1154 = vmatpush1.bf16.msra.mxu1 %v4014_v47 }
 0x1c9   : > { %1155 = vmatprep.subr.bf16.mxu1 %v4019_v48 }
 0x1cc   : > { %1156 = vmatpush1.bf16.msra.mxu1 %v4017_v49 }
 0x1cd   : > { %1157 = vmatprep.subr.bf16.mxu1 %v4022_v50 }
 0x1d0   : > { %1158 = vmatpush1.bf16.msra.mxu1 %v4020_v51  ;;  %v491_v51 = vld [vmem:[#allocation13] sm:$0xff] }
 0x1d1   : > { %1159 = vmatprep.subr.bf16.mxu1 %v4025_v52 }
 0x1d4   : > { %1160 = vmatpush1.bf16.msra.mxu1 %v4023_v53  ;;  %v492_v53 = vld [vmem:[#allocation13 + $0x8] sm:$0xff] }
 0x1d5   : > { %1161 = vmatprep.subr.bf16.mxu1 %v4028_v54 }
 0x1d8   : > { %1162 = vmatpush1.bf16.msra.mxu1 %v4026_v55 }
 0x1d9   : > { %1163 = vmatprep.subr.bf16.mxu1 %v4031_v56 }
 0x1dc   : > { %1164 = vmatpush1.bf16.msra.mxu1 %v4029_v57 }
 0x1dd   : > { %1165 = vmatprep.subr.bf16.mxu1 %v4034_v58 }
 0x1e0   : > { %1166 = vmatpush1.bf16.msra.mxu1 %v4032_v59 }
 0x1e1   : > { %3767 = vmatprep.subr.bf16.mxu1 %v4537_v10 }
 0x1e3   : > { %1168 = vmatmul.mubr.bf16.vlgmr.msra.gmra.mrb[4].mxu1 %v4988_v33 }
 0x1e4   : > { %3769 = vmatprep.mubr.msk.bf16.mxu1 %vm4538_vm0, %v4537_v10 }
 0x276   : > { %v5023_v60 = vpop.f32.mrb[0].mxu1  ;;  %v5025_v61 = vpop.f32.mrb[0].mxu0 }
 0x277   : > { %v1128_v62 = vpop.f32.mrb[1].mxu1  ;;  %v5027_v63 = vpop.f32.mrb[1].mxu0  ;;  %v1221_v45 = vmul.f32 %v5023_v60, %v487_v17 }
 0x278   : > { %v5029_v0 = vpop.f32.mrb[2].mxu0  ;;  %1355 = vrot.lane.b32.xlu1 %v1128_v62, %s4536_s26  ;;  %v1130_v1 = vpop.f32.mrb[2].mxu1  ;;  %v1353_v22 = vmul.f32 %v1128_v62, %v487_v17 }
 0x279   : > { %v1306_v2 = vpack.c.bf16 %v5029_v0, %v5025_v61  ;;  %v1132_v3 = vpop.f32.mrb[3].mxu1  ;;  %v5033_v7 = vpop.f32.mrb[3].mxu0  ;;  %v1222_v46 = vmul.f32 %v1130_v1, %v488_v18 }
 0x27a   : > { %v1437_v8 = vpack.c.bf16 %v5033_v7, %v5027_v63  ;;  %v1354_v23 = vmul.f32 %v1132_v3, %v488_v18 }
 0x27c   : > { %1357 = vrot.lane.b32.xlu1 %v1132_v3, %s4536_s26 }
 0x2b6   : > { %v1169_v11 = vpop.f32.mrb[4].mxu1 }
 0x2b7   : > { %1233 = vrot.lane.b32.xlu0 %v1169_v11, %s4536_s26  ;;  %v1171_v12 = vpop.f32.mrb[5].mxu1  ;;  %v1231_v32 = vmul.f32 %v1169_v11, %v487_v17 }
 0x2b8   : > { %1365 = vrot.lane.b32.xlu1 %v1171_v12, %s4536_s26  ;;  %v1173_v13 = vpop.f32.mrb[6].mxu1  ;;  %v1363_v35 = vmul.f32 %v1171_v12, %v487_v17 }
 0x2b9   : > { %v1175_v14 = vpop.f32.mrb[7].mxu1  ;;  %v1232_v33 = vmul.f32 %v1173_v13, %v488_v18 }
 0x2ba   : > { %v1364_v36 = vmul.f32 %v1175_v14, %v488_v18 }
 0x2bc   : > { %1235 = vrot.lane.b32.xlu1 %v1173_v13, %s4536_s26 }
 0x2c0   : > { %1367 = vrot.lane.b32.xlu1 %v1175_v14, %s4536_s26 }
 0x2c4   : > { %1223 = vrot.lane.b32.xlu1 %v5023_v60, %s4536_s26 }
 0x2c8   : > { %1225 = vrot.lane.b32.xlu1 %v1130_v1, %s4536_s26 }
 0x2ea   : > { %v1356_v16 = vpop.permute.xlu1 %1355 }
 0x2eb   : > { %v1359_v20 = vmul.f32 %v1356_v16, %v489_v15 }
 0x2ed   : > { %v1361_v25 = vadd.f32 %v1359_v20, %v1353_v22 }
 0x2ee   : > { %v1358_v21 = vpop.permute.xlu1 %1357 }
 0x2ef   : > { %v1360_v24 = vmul.f32 %v1358_v21, %v490_v19 }
 0x2f1   : > { %v1362_v26 = vadd.f32 %v1360_v24, %v1354_v23 }
 0x2f3   : > { %v1373_v27 = vpack.c.bf16 %v1362_v26, %v1361_v25 }
 0x329   : > { %v1234_v28 = vpop.permute.xlu0 %1233 }
 0x32a   : > { %v1366_v29 = vpop.permute.xlu1 %1365  ;;  %v1237_v30 = vmul.f32 %v1234_v28, %v489_v15 }
 0x32b   : > { %v1369_v5 = vmul.f32 %v1366_v29, %v489_v15 }
 0x32c   : > { %v1239_v4 = vadd.f32 %v1237_v30, %v1231_v32  ;;  %v4037_v32 = vld [vmem:[%s4886_s3 + $0x4] ss:$8 sps:$4 sm:$0xff]  }
 0x32d   : > { %v1371_v39 = vadd.f32 %v1369_v5, %v1363_v35  ;;  %v4041_v5 = vld [vmem:[%s4886_s3 + $0x20] ss:$8 sps:$4 sm:$0xff]   ;;  %v4049_v35 = vld [vmem:[%s4886_s3 + $0x44] ss:$8 sps:$4 sm:$0xff]  }
 0x32e   : > { %v1236_v31 = vpop.permute.xlu1 %1235 }
 0x32f   : > { %v1238_v34 = vmul.f32 %v1236_v31, %v490_v19  ;;  %v4035_v31 = vld [vmem:[%s4886_s3] ss:$8 sps:$4 sm:$0xff]  }
 0x331   : > { %v1240_v6 = vadd.f32 %v1238_v34, %v1232_v33  ;;  %v4040_v33 = vld [vmem:[%s4886_s3 + $0x14] ss:$8 sps:$4 sm:$0xff]   ;;  %v4038_v34 = vld [vmem:[%s4886_s3 + $0x10] ss:$8 sps:$4 sm:$0xff]  }
 0x332   : > { %v1368_v9 = vpop.permute.xlu1 %1367 }
 0x333   : > { %v1242_v37 = vpack.c.bf16 %v1240_v6, %v1239_v4  ;;  %v1370_v38 = vmul.f32 %v1368_v9, %v490_v19  ;;  %v4043_v4 = vld [vmem:[%s4886_s3 + $0x24] ss:$8 sps:$4 sm:$0xff]   ;;  %v4046_v6 = vld [vmem:[%s4886_s3 + $0x34] ss:$8 sps:$4 sm:$0xff]   ;;  %v4044_v9 = vld [vmem:[%s4886_s3 + $0x30] ss:$8 sps:$4 sm:$0xff]  }
 0x335   : > { %v1372_v40 = vadd.f32 %v1370_v38, %v1364_v36  ;;  %3756 = vmatpush3.bf16.xpose.msra.mxu0 %v1242_v37  ;;  %v4047_v36 = vld [vmem:[%s4886_s3 + $0x40] ss:$8 sps:$4 sm:$0xff]   ;;  %v4052_v37 = vld [vmem:[%s4886_s3 + $0x54] ss:$8 sps:$4 sm:$0xff]   ;;  %v4050_v38 = vld [vmem:[%s4886_s3 + $0x50] ss:$8 sps:$4 sm:$0xff]  }
 0x336   : > { %v1224_v41 = vpop.permute.xlu1 %1223  ;;  %3761 = vmatprep.subr.bf16.mxu0 %v4537_v10 }
 0x337   : > { %v1374_v42 = vpack.c.bf16 %v1372_v40, %v1371_v39  ;;  %v1227_v43 = vmul.f32 %v1224_v41, %v489_v15  ;;  %v4055_v39 = vld [vmem:[%s4886_s3 + $0x64] ss:$8 sps:$4 sm:$0xff]   ;;  %v4053_v40 = vld [vmem:[%s4886_s3 + $0x60] ss:$8 sps:$4 sm:$0xff]   ;;  %v4058_v41 = vld [vmem:[%s4886_s3 + $0x74] ss:$8 sps:$4 sm:$0xff]  }
 0x339   : > { %3768 = vmatpush3.bf16.xpose.msra.mxu1 %v1374_v42  ;;  %v1229_v48 = vadd.f32 %v1227_v43, %v1221_v45  ;;  %v4056_v42 = vld [vmem:[%s4886_s3 + $0x70] ss:$8 sps:$4 sm:$0xff]   ;;  %v4061_v43 = vld [vmem:[%s4886_s3 + $0x84] ss:$8 sps:$4 sm:$0xff]   ;;  %v4064_v45 = vld [vmem:[%s4886_s3 + $0x94] ss:$8 sps:$4 sm:$0xff]  }
 0x33a   : > { %v1226_v44 = vpop.permute.xlu1 %1225  ;;  %3773 = vmatprep.subr.bf16.mxu1 %v4537_v10 }
 0x33b   : > { %v1228_v47 = vmul.f32 %v1226_v44, %v490_v19  ;;  %v4059_v44 = vld [vmem:[%s4886_s3 + $0x80] ss:$8 sps:$4 sm:$0xff]  }
 0x33d   : > { %v1230_v49 = vadd.f32 %v1228_v47, %v1222_v46  ;;  %v4062_v46 = vld [vmem:[%s4886_s3 + $0x90] ss:$8 sps:$4 sm:$0xff]   ;;  %v4067_v47 = vld [vmem:[%s4886_s3 + $0xa4] ss:$8 sps:$4 sm:$0xff]  }
 0x33f   : > { %v1241_v50 = vpack.c.bf16 %v1230_v49, %v1229_v48  ;;  %v4065_v48 = vld [vmem:[%s4886_s3 + $0xa0] ss:$8 sps:$4 sm:$0xff]   ;;  %v4070_v49 = vld [vmem:[%s4886_s3 + $0xb4] ss:$8 sps:$4 sm:$0xff]  }
 0x340   : > { %3770 = vmatmul.mubr.bf16.vlgmr.msra.gmra.mrb[8].mxu1 %v1373_v27 }
 0x341   : > { %3758 = vmatmul.mubr.bf16.vlgmr.msra.gmra.mrb[4].mxu0 %v1241_v50  ;;  %3774 = vmatpush3.bf16.msra.mxu1 %v1437_v8  ;;  %v4068_v50 = vld [vmem:[%s4886_s3 + $0xb0] ss:$8 sps:$4 sm:$0xff]  }
 0x342   : > { %3762 = vmatpush3.bf16.msra.mxu0 %v1306_v2  ;;  %3775 = vmatprep.mubr.msk.bf16.mxu1 %vm4538_vm0, %v4537_v10 }
 0x343   : > { %3763 = vmatprep.mubr.msk.bf16.mxu0 %vm4538_vm0, %v4537_v10  ;;  %1678 = vmatprep.subr.bf16.mxu1 %v4037_v32  ;;  %v1756_v32 = vld [vmem:[%s4888_s27 + $0x48] sm:$0xff] }
 0x413   : > { %v1409_v52 = vpop.f32.mrb[8].mxu1 }
 0x414   : > { %v1410_v54 = vadd.f32 %v1409_v52, %v491_v51  ;;  %v1277_v55 = vpop.f32.mrb[4].mxu0  ;;  %v3771_v56 = vpop.f32.mrb[9].mxu1  ;;  %v4071_v52 = vld [vmem:[%s4886_s3 + $0xc0] ss:$8 sps:$4 sm:$0xff]  }
 0x415   : > { %v3759_v57 = vpop.f32.mrb[5].mxu0  ;;  %v1412_v58 = vpop.f32.mrb[10].mxu1  ;;  %v1278_v1 = vadd.f32 %v1277_v55, %v491_v51  ;;  %v4073_v51 = vld [vmem:[%s4886_s3 + $0xc4] ss:$8 sps:$4 sm:$0xff]   ;;  %v4077_v56 = vld [vmem:[%s4886_s3 + $0xe0] ss:$8 sps:$4 sm:$0xff]  }
 0x416   : > { %v1413_v59 = vadd.f32 %v1412_v58, %v492_v53  ;;  %v1280_v60 = vpop.f32.mrb[6].mxu0  ;;  %v3772_v62 = vpop.f32.mrb[11].mxu1  ;;  %v1416_v61 = vsel %vm1284_vm1, %v1410_v54, -inf  ;;  %v4079_v55 = vld [vmem:[%s4886_s3 + $0xe4] ss:$8 sps:$4 sm:$0xff]  }
 0x417   : > { %v1281_v63 = vadd.f32 %v1280_v60, %v492_v53  ;;  %v3760_v0 = vpop.f32.mrb[7].mxu0  ;;  %1417 = vmax.xlane.f32.xlu1 %v1416_v61  ;;  %v1285_v7 = vsel %vm1284_vm1, %v1278_v1, -inf  ;;  %v4076_v53 = vld [vmem:[%s4886_s3 + $0xd4] ss:$8 sps:$4 sm:$0xff]   ;;  %v4080_v58 = vld [vmem:[%s4886_s3 + $0xf0] ss:$8 sps:$4 sm:$0xff]  }
 0x418   : > { %v1419_v2 = vsel %vm1284_vm1, %v1413_v59, -inf  ;;  %v4082_v57 = vld [vmem:[%s4886_s3 + $0xf4] ss:$8 sps:$4 sm:$0xff]  }
 0x419   : > { %1420 = vmax.xlane.f32.xlu0 %v1419_v2  ;;  %v1288_v3 = vsel %vm1284_vm1, %v1281_v63, -inf }
 0x41b   : > { %1289 = vmax.xlane.f32.xlu1 %v1288_v3 }
 0x41d   : > { %1286 = vmax.xlane.f32.xlu0 %v1285_v7 }
 0x4a4   : > { %v1418_v8 = vpop.xlane.xlu1 %1417 }
 0x4a5   : > { %v1422_v10 = vsub.f32 %v1410_v54, %v1418_v8  ;;  %v4074_v54 = vld [vmem:[%s4886_s3 + $0xd0] ss:$8 sps:$4 sm:$0xff]  }
 0x4a6   : > { %v1421_v11 = vpop.xlane.xlu0 %1420 }
 0x4a7   : > { %v1424_v12 = vmul.f32 1.442695, %v1422_v10  ;;  %v1423_v13 = vsub.f32 %v1413_v59, %v1421_v11 }
 0x4a8   : > { %v1290_v14 = vpop.xlane.xlu1 %1289 }
 0x4a9   : > { %4183 = vpow2.f32 %v1424_v12  ;;  %v1426_v15 = vmul.f32 1.442695, %v1423_v13  ;;  %v1292_v16 = vsub.f32 %v1281_v63, %v1290_v14 }
 0x4aa   : > { %v1287_v17 = vpop.xlane.xlu0 %1286 }
 0x4ab   : > { %4185 = vpow2.f32 %v1426_v15  ;;  %v1295_v18 = vmul.f32 1.442695, %v1292_v16  ;;  %v1291_v19 = vsub.f32 %v1278_v1, %v1287_v17 }
 0x4ad   : > { %4187 = vpow2.f32 %v1295_v18  ;;  %v1293_v20 = vmul.f32 1.442695, %v1291_v19 }
 0x4af   : > { %4189 = vpow2.f32 %v1293_v20 }
 0x4b3   : > { %v4184_v21 = vpop.eup %4183 }
 0x4b4   : > { %v1428_v22 = vsel %vm1284_vm1, %v4184_v21, 0.0 }
 0x4b5   : > { %v4186_v23 = vpop.eup %4185  ;;  %1429 = vadd.xlane.f32.xlu0 %v1428_v22  ;;  %v1751_v22 = vld [vmem:[%s4888_s27 + $0x20] sm:$0xff] }
 0x4b6   : > { %v1431_v24 = vsel %vm1284_vm1, %v4186_v23, 0.0  ;;  %v1436_v25 = vpack.c.bf16 %v4186_v23, %v4184_v21  ;;  %v1747_v21 = vld [vmem:[%s4888_s27] sm:$0xff]  ;;  %v1748_v23 = vld [vmem:[%s4888_s27 + $0x8] sm:$0xff] }
 0x4b7   : > { %v4188_v26 = vpop.eup %4187  ;;  %1432 = vadd.xlane.f32.xlu1 %v1431_v24  ;;  %v3540_v24 = vcombine.low %v1747_v21, %v1751_v22 }
 0x4b8   : > { %3776 = vmatmul.mubr.msk.bf16.vlgmr.msra.gmra.mrb[12].mxu1 %vm1284_vm1, %v1436_v25  ;;  %v1300_v28 = vsel %vm1284_vm1, %v4188_v26, 0.0  ;;  %v3541_v25 = vcombine.high %v1747_v21, %v1751_v22  ;;  %v1812_v21 = vld [vmem:[%s4888_s27 + $0x208] sm:$0xff] }
 0x4b9   : > { %v4190_v27 = vpop.eup %4189  ;;  %1679 = vmatpush1.bf16.msra.mxu1 %v4035_v31  ;;  %v1816_v22 = vld [vmem:[%s4888_s27 + $0x228] sm:$0xff] }
 0x4ba   : > { %v1297_v29 = vsel %vm1284_vm1, %v4190_v27, 0.0  ;;  %v1305_v30 = vpack.c.bf16 %v4188_v26, %v4190_v27  ;;  %1680 = vmatprep.subr.bf16.mxu1 %v4040_v33  ;;  %v1752_v26 = vld [vmem:[%s4888_s27 + $0x28] sm:$0xff]  ;;  %v1755_v27 = vld [vmem:[%s4888_s27 + $0x40] sm:$0xff]  ;;  %2515 = vmatprep.subr.bf16.mxu0 %v3541_v25 }
 0x4bb   : > { %1301 = vadd.xlane.f32.xlu1 %v1300_v28  ;;  %1298 = vadd.xlane.f32.xlu0 %v1297_v29  ;;  %v1759_v28 = vld [vmem:[%s4888_s27 + $0x60] sm:$0xff]  ;;  %v3542_v29 = vcombine.low %v1748_v23, %v1752_v26  ;;  %v1760_v33 = vld [vmem:[%s4888_s27 + $0x68] sm:$0xff] }
 0x4bc   : > { %3764 = vmatmul.mubr.msk.bf16.vlgmr.msra.gmra.mrb[8].mxu0 %vm1284_vm1, %v1305_v30  ;;  %v3543_v30 = vcombine.high %v1748_v23, %v1752_v26  ;;  %v3549_v31 = vcombine.high %v1755_v27, %v1759_v28  ;;  %v3607_v26 = vcombine.high %v1812_v21, %v1816_v22 }
 0x4bd   : > { %1681 = vmatpush1.bf16.msra.mxu1 %v4038_v34  ;;  %v1763_v34 = vld [vmem:[%s4888_s27 + $0x80] sm:$0xff]  ;;  %2516 = vmatpush1.bf16.msra.mxu0 %v3540_v24 }
 0x4be   : > { %1682 = vmatprep.subr.bf16.mxu1 %v4043_v4  ;;  %v3551_v4 = vcombine.high %v1756_v32, %v1760_v33  ;;  %2517 = vmatprep.subr.bf16.mxu0 %v3549_v31 }
 0x4c1   : > { %1683 = vmatpush1.bf16.msra.mxu1 %v4041_v5  ;;  %v1767_v5 = vld [vmem:[%s4888_s27 + $0xa0] sm:$0xff] }
 0x4c2   : > { %1684 = vmatprep.subr.bf16.mxu1 %v4046_v6  ;;  %v1764_v6 = vld [vmem:[%s4888_s27 + $0x88] sm:$0xff] }
 0x4c5   : > { %1685 = vmatpush1.bf16.msra.mxu1 %v4044_v9  ;;  %v1768_v9 = vld [vmem:[%s4888_s27 + $0xa8] sm:$0xff] }
 0x4c6   : > { %1686 = vmatprep.subr.bf16.mxu1 %v4049_v35  ;;  %v3548_v35 = vcombine.low %v1755_v27, %v1759_v28  ;;  %v1819_v27 = vld [vmem:[%s4888_s27 + $0x240] sm:$0xff] }
 0x4c7   : > { %v1823_v28 = vld [vmem:[%s4888_s27 + $0x260] sm:$0xff] }
 0x4c8   : > { %2518 = vmatpush1.bf16.msra.mxu0 %v3548_v35  ;;  %v3612_v35 = vcombine.low %v1819_v27, %v1823_v28 }
 0x4c9   : > { %1687 = vmatpush1.bf16.msra.mxu1 %v4047_v36  ;;  %v3550_v36 = vcombine.low %v1756_v32, %v1760_v33  ;;  %v3606_v32 = vcombine.low %v1812_v21, %v1816_v22  ;;  %v3613_v33 = vcombine.high %v1819_v27, %v1823_v28  ;;  %v1859_v21 = vld [vmem:[%s4888_s27 + $0x380] sm:$0xff]  ;;  %v1864_v27 = vld [vmem:[%s4888_s27 + $0x3a8] sm:$0xff] }
 0x4ca   : > { %1688 = vmatprep.subr.bf16.mxu1 %v4052_v37  ;;  %v3557_v37 = vcombine.high %v1763_v34, %v1767_v5  ;;  %v1863_v22 = vld [vmem:[%s4888_s27 + $0x3a0] sm:$0xff] }
 0x4cc   : > { %2519 = vmatprep.subr.bf16.mxu0 %v3557_v37 }
 0x4cd   : > { %1689 = vmatpush1.bf16.msra.mxu1 %v4050_v38  ;;  %v3559_v38 = vcombine.high %v1764_v6, %v1768_v9 }
 0x4ce   : > { %1690 = vmatprep.subr.bf16.mxu1 %v4055_v39  ;;  %v1771_v39 = vld [vmem:[%s4888_s27 + $0xc0] sm:$0xff] }
 0x4d1   : > { %1691 = vmatpush1.bf16.msra.mxu1 %v4053_v40  ;;  %v1775_v40 = vld [vmem:[%s4888_s27 + $0xe0] sm:$0xff] }
 0x4d2   : > { %1692 = vmatprep.subr.bf16.mxu1 %v4058_v41  ;;  %v1772_v41 = vld [vmem:[%s4888_s27 + $0xc8] sm:$0xff] }
 0x4d5   : > { %1693 = vmatpush1.bf16.msra.mxu1 %v4056_v42  ;;  %v1776_v42 = vld [vmem:[%s4888_s27 + $0xe8] sm:$0xff] }
 0x4d6   : > { %1694 = vmatprep.subr.bf16.mxu1 %v4061_v43  ;;  %v3556_v43 = vcombine.low %v1763_v34, %v1767_v5  ;;  %v1831_v5 = vld [vmem:[%s4888_s27 + $0x2a0] sm:$0xff] }
 0x4d8   : > { %2520 = vmatpush1.bf16.msra.mxu0 %v3556_v43 }
 0x4d9   : > { %1695 = vmatpush1.bf16.msra.mxu1 %v4059_v44  ;;  %v3558_v44 = vcombine.low %v1764_v6, %v1768_v9  ;;  %v1828_v6 = vld [vmem:[%s4888_s27 + $0x288] sm:$0xff] }
 0x4da   : > { %1696 = vmatprep.subr.bf16.mxu1 %v4064_v45  ;;  %v3565_v45 = vcombine.high %v1771_v39, %v1775_v40  ;;  %v1832_v9 = vld [vmem:[%s4888_s27 + $0x2a8] sm:$0xff] }
 0x4dc   : > { %2521 = vmatprep.subr.bf16.mxu0 %v3565_v45  ;;  %v4236_v45 = vld [vmem:[#allocation14 + $0x8] sm:$0xff] }
 0x4dd   : > { %1697 = vmatpush1.bf16.msra.mxu1 %v4062_v46  ;;  %v3567_v46 = vcombine.high %v1772_v41, %v1776_v42 }
 0x4de   : > { %1698 = vmatprep.subr.bf16.mxu1 %v4067_v47  ;;  %v1779_v47 = vld [vmem:[%s4888_s27 + $0x100] sm:$0xff] }
 0x4e1   : > { %1699 = vmatpush1.bf16.msra.mxu1 %v4065_v48  ;;  %v1783_v48 = vld [vmem:[%s4888_s27 + $0x120] sm:$0xff] }
 0x4e2   : > { %1700 = vmatprep.subr.bf16.mxu1 %v4070_v49  ;;  %v1780_v49 = vld [vmem:[%s4888_s27 + $0x108] sm:$0xff] }
 0x4e5   : > { %1701 = vmatpush1.bf16.msra.mxu1 %v4068_v50  ;;  %v1784_v50 = vld [vmem:[%s4888_s27 + $0x128] sm:$0xff] }
 0x4e6   : > { %1702 = vmatprep.subr.bf16.mxu1 %v4073_v51  ;;  %v3564_v51 = vcombine.low %v1771_v39, %v1775_v40  ;;  %v3622_v40 = vcombine.low %v1828_v6, %v1832_v9 }
 0x4e8   : > { %2522 = vmatpush1.bf16.msra.mxu0 %v3564_v51 }
 0x4e9   : > { %1703 = vmatpush1.bf16.msra.mxu1 %v4071_v52  ;;  %v3566_v52 = vcombine.low %v1772_v41, %v1776_v42  ;;  %v4235_v42 = vld [vmem:[#allocation14] sm:$0xff] }
 0x4ea   : > { %1704 = vmatprep.subr.bf16.mxu1 %v4076_v53  ;;  %v3573_v53 = vcombine.high %v1779_v47, %v1783_v48 }
 0x4ec   : > { %2523 = vmatprep.subr.bf16.mxu0 %v3573_v53 }
 0x4ed   : > { %1705 = vmatpush1.bf16.msra.mxu1 %v4074_v54  ;;  %v3575_v54 = vcombine.high %v1780_v49, %v1784_v50 }
 0x4ee   : > { %1706 = vmatprep.subr.bf16.mxu1 %v4079_v55  ;;  %v1787_v55 = vld [vmem:[%s4888_s27 + $0x140] sm:$0xff] }
 0x4f1   : > { %1707 = vmatpush1.bf16.msra.mxu1 %v4077_v56  ;;  %v1791_v56 = vld [vmem:[%s4888_s27 + $0x160] sm:$0xff] }
 0x4f2   : > { %1708 = vmatprep.subr.bf16.mxu1 %v4082_v57  ;;  %v1788_v57 = vld [vmem:[%s4888_s27 + $0x148] sm:$0xff] }
 0x4f5   : > { %1709 = vmatpush1.bf16.msra.mxu1 %v4080_v58  ;;  %v1792_v58 = vld [vmem:[%s4888_s27 + $0x168] sm:$0xff] }
 0x4f6   : > { %2558 = vmatprep.subr.bf16.mxu1 %v3543_v30  ;;  %v1824_v30 = vld [vmem:[%s4888_s27 + $0x268] sm:$0xff] }
 0x542   : > { %v1430_v60 = vpop.xlane.xlu0 %1429 }
 0x543   : > { %4191 = vrcp.f32 %v1430_v60  ;;  %v3574_v60 = vcombine.low %v1780_v49, %v1784_v50 }
 0x544   : > { %v1433_v59 = vpop.xlane.xlu1 %1432 }
 0x545   : > { %4193 = vrcp.f32 %v1433_v59  ;;  %v3572_v59 = vcombine.low %v1779_v47, %v1783_v48  ;;  %v4237_v48 = vld [vmem:[#allocation14 + $0x10] sm:$0xff] }
 0x547   : > { %2524 = vmatpush1.bf16.msra.mxu0 %v3572_v59  ;;  %v1835_v59 = vld [vmem:[%s4888_s27 + $0x2c0] sm:$0xff] }
 0x548   : > { %v1302_v62 = vpop.xlane.xlu1 %1301  ;;  %v1299_v61 = vpop.xlane.xlu0 %1298 }
 0x549   : > { %4195 = vrcp.f32 %v1302_v62  ;;  %v3581_v62 = vcombine.high %v1787_v55, %v1791_v56 }
 0x54a   : > { %4197 = vrcp.f32 %v1299_v61  ;;  %v3583_v61 = vcombine.high %v1788_v57, %v1792_v58 }
 0x54b   : > { %2525 = vmatprep.subr.bf16.mxu0 %v3581_v62  ;;  %v1836_v62 = vld [vmem:[%s4888_s27 + $0x2c8] sm:$0xff] }
 0x54d   : > { %v4192_v0 = vpop.eup %4191 }
 0x54f   : > { %v4194_v2 = vpop.eup %4193 }
 0x553   : > { %v4196_v12 = vpop.eup %4195 }
 0x554   : > { %v4198_v15 = vpop.eup %4197 }
 0x58b   : > { %v1475_v63 = vpop.f32.mrb[12].mxu1 }
 0x58c   : > { %v3777_v1 = vpop.f32.mrb[13].mxu1  ;;  %v1482_v7 = vmul.f32 %v4192_v0, %v1475_v63  ;;  %v1795_v63 = vld [vmem:[%s4888_s27 + $0x180] sm:$0xff] }
 0x58d   : > { %v1478_v3 = vpop.f32.mrb[14].mxu1  ;;  %v1799_v0 = vld [vmem:[%s4888_s27 + $0x1a0] sm:$0xff]  ;;  %v1796_v1 = vld [vmem:[%s4888_s27 + $0x188] sm:$0xff] }
 0x58e   : > { %v1483_v8 = vmul.f32 %v4194_v2, %v1478_v3  ;;  %v3778_v10 = vpop.f32.mrb[15].mxu1  ;;  %v1800_v2 = vld [vmem:[%s4888_s27 + $0x1a8] sm:$0xff]  ;;  %v3580_v3 = vcombine.low %v1787_v55, %v1791_v56 }
 0x58f   : > { %v1344_v11 = vpop.f32.mrb[8].mxu0  ;;  %v3591_v10 = vcombine.high %v1796_v1, %v1800_v2 }
 0x590   : > { %v1485_v13 = vpack.c.bf16 %v1483_v8, %v1482_v7  ;;  %v3765_v14 = vpop.f32.mrb[9].mxu0  ;;  %v1351_v17 = vmul.f32 %v4198_v15, %v1344_v11  ;;  %v3582_v7 = vcombine.low %v1788_v57, %v1792_v58  ;;  %v3589_v8 = vcombine.high %v1795_v63, %v1799_v0  ;;  %v1803_v11 = vld [vmem:[%s4888_s27 + $0x1c0] sm:$0xff]  ;;  %2526 = vmatpush1.bf16.msra.mxu0 %v3580_v3 }
 0x591   : > { %v1347_v16 = vpop.f32.mrb[10].mxu0  ;;  %v1808_v14 = vld [vmem:[%s4888_s27 + $0x1e8] sm:$0xff]  ;;  %v3588_v15 = vcombine.low %v1795_v63, %v1799_v0  ;;  %v1843_v3 = vld [vmem:[%s4888_s27 + $0x300] sm:$0xff] }
 0x592   : > { %v1352_v18 = vmul.f32 %v4196_v12, %v1347_v16  ;;  %v3766_v19 = vpop.f32.mrb[11].mxu0  ;;  %1710 = vmatprep.mubr.bf16.mxu1 %v1485_v13  ;;  %v1807_v12 = vld [vmem:[%s4888_s27 + $0x1e0] sm:$0xff]  ;;  %v1804_v13 = vld [vmem:[%s4888_s27 + $0x1c8] sm:$0xff]  ;;  %2527 = vmatprep.subr.bf16.mxu0 %v3589_v8  ;;  %v3590_v16 = vcombine.low %v1796_v1, %v1800_v2 }
 0x593   : > { %v1811_v19 = vld [vmem:[%s4888_s27 + $0x200] sm:$0xff]  ;;  %v3596_v23 = vcombine.low %v1803_v11, %v1807_v12  ;;  %v3598_v24 = vcombine.low %v1804_v13, %v1808_v14  ;;  %v1840_v63 = vld [vmem:[%s4888_s27 + $0x2e8] sm:$0xff] }
 0x594   : > { %v1484_v20 = vpack.c.bf16 %v1352_v18, %v1351_v17  ;;  %v3597_v17 = vcombine.high %v1803_v11, %v1807_v12  ;;  %v3599_v18 = vcombine.high %v1804_v13, %v1808_v14  ;;  %2528 = vmatpush1.bf16.msra.mxu0 %v3588_v15  ;;  %v3630_v1 = vcombine.low %v1836_v62, %v1840_v63  ;;  %v1844_v8 = vld [vmem:[%s4888_s27 + $0x308] sm:$0xff]  ;;  %v1851_v15 = vld [vmem:[%s4888_s27 + $0x340] sm:$0xff] }
 0x595   : > { %v3631_v2 = vcombine.high %v1836_v62, %v1840_v63  ;;  %v1848_v11 = vld [vmem:[%s4888_s27 + $0x328] sm:$0xff]  ;;  %v1758_v62 = vld [vmem:[%s4888_s27 + $0x58] sm:$0xff] }
 0x596   : > { %1711 = vmatmul.mubr.bf16.vlgmr.msra.gmra.mrb[16].mxu1 %v1484_v20  ;;  %v1815_v20 = vld [vmem:[%s4888_s27 + $0x220] sm:$0xff]  ;;  %2529 = vmatprep.subr.bf16.mxu0 %v3597_v17  ;;  %v3638_v13 = vcombine.low %v1844_v8, %v1848_v11  ;;  %v3639_v14 = vcombine.high %v1844_v8, %v1848_v11  ;;  %v1852_v17 = vld [vmem:[%s4888_s27 + $0x348] sm:$0xff]  ;;  %v1766_v8 = vld [vmem:[%s4888_s27 + $0x98] sm:$0xff] }
 0x597   : > { %2559 = vmatpush1.bf16.msra.mxu1 %v3542_v29  ;;  %v3605_v25 = vcombine.high %v1811_v19, %v1815_v20  ;;  %v1820_v29 = vld [vmem:[%s4888_s27 + $0x248] sm:$0xff]  ;;  %v3604_v31 = vcombine.low %v1811_v19, %v1815_v20 }
 0x598   : > { %2560 = vmatprep.subr.bf16.mxu1 %v3551_v4  ;;  %2530 = vmatpush1.bf16.msra.mxu0 %v3596_v23  ;;  %v3615_v34 = vcombine.high %v1820_v29, %v1824_v30  ;;  %v1827_v4 = vld [vmem:[%s4888_s27 + $0x280] sm:$0xff]  ;;  %v1856_v20 = vld [vmem:[%s4888_s27 + $0x368] sm:$0xff] }
 0x599   : > { %2531 = vmatprep.subr.bf16.mxu0 %v3605_v25  ;;  %v3621_v37 = vcombine.high %v1827_v4, %v1831_v5  ;;  %v3620_v39 = vcombine.low %v1827_v4, %v1831_v5  ;;  %v3646_v23 = vcombine.low %v1852_v17, %v1856_v20  ;;  %v3653_v25 = vcombine.high %v1859_v21, %v1863_v22 }
 0x59b   : > { %2561 = vmatpush1.bf16.msra.mxu1 %v3550_v36  ;;  %v3614_v36 = vcombine.low %v1820_v29, %v1824_v30  ;;  %v1867_v29 = vld [vmem:[%s4888_s27 + $0x3c0] sm:$0xff] }
 0x59c   : > { %2562 = vmatprep.subr.bf16.mxu1 %v3559_v38  ;;  %2532 = vmatpush1.bf16.msra.mxu0 %v3604_v31  ;;  %v3623_v38 = vcombine.high %v1828_v6, %v1832_v9  ;;  %v1871_v30 = vld [vmem:[%s4888_s27 + $0x3e0] sm:$0xff]  ;;  %v1868_v31 = vld [vmem:[%s4888_s27 + $0x3c8] sm:$0xff] }
 0x59d   : > { %2533 = vmatprep.subr.bf16.mxu0 %v3613_v33  ;;  %v3652_v33 = vcombine.low %v1859_v21, %v1863_v22  ;;  %v3661_v4 = vcombine.high %v1867_v29, %v1871_v30  ;;  %v3660_v6 = vcombine.low %v1867_v29, %v1871_v30 }
 0x59f   : > { %2563 = vmatpush1.bf16.msra.mxu1 %v3558_v44 }
 0x5a0   : > { %2564 = vmatprep.subr.bf16.mxu1 %v3567_v46  ;;  %2534 = vmatpush1.bf16.msra.mxu0 %v3612_v35  ;;  %v1749_v35 = vld [vmem:[%s4888_s27 + $0x10] sm:$0xff] }
 0x5a1   : > { %2535 = vmatprep.subr.bf16.mxu0 %v3621_v37  ;;  %v1750_v37 = vld [vmem:[%s4888_s27 + $0x18] sm:$0xff] }
 0x5a3   : > { %2565 = vmatpush1.bf16.msra.mxu1 %v3566_v52  ;;  %v4238_v52 = vld [vmem:[#allocation14 + $0x18] sm:$0xff] }
 0x5a4   : > { %2566 = vmatprep.subr.bf16.mxu1 %v3575_v54  ;;  %2536 = vmatpush1.bf16.msra.mxu0 %v3620_v39  ;;  %v1754_v39 = vld [vmem:[%s4888_s27 + $0x38] sm:$0xff] }
 0x5a7   : > { %2567 = vmatpush1.bf16.msra.mxu1 %v3574_v60  ;;  %v1839_v60 = vld [vmem:[%s4888_s27 + $0x2e0] sm:$0xff] }
 0x5a8   : > { %2568 = vmatprep.subr.bf16.mxu1 %v3583_v61  ;;  %v3629_v61 = vcombine.high %v1835_v59, %v1839_v60  ;;  %v3628_v0 = vcombine.low %v1835_v59, %v1839_v60  ;;  %v1757_v59 = vld [vmem:[%s4888_s27 + $0x50] sm:$0xff] }
 0x5a9   : > { %v1761_v60 = vld [vmem:[%s4888_s27 + $0x70] sm:$0xff] }
 0x5aa   : > { %2537 = vmatprep.subr.bf16.mxu0 %v3629_v61  ;;  %v1762_v61 = vld [vmem:[%s4888_s27 + $0x78] sm:$0xff]  ;;  %v3552_v11 = vcombine.low %v1757_v59, %v1761_v60 }
 0x5ab   : > { %2569 = vmatpush1.bf16.msra.mxu1 %v3582_v7  ;;  %2538 = vmatpush1.bf16.msra.mxu0 %v3628_v0  ;;  %v1847_v7 = vld [vmem:[%s4888_s27 + $0x320] sm:$0xff] }
 0x5ac   : > { %2570 = vmatprep.subr.bf16.mxu1 %v3591_v10  ;;  %v3637_v10 = vcombine.high %v1843_v3, %v1847_v7  ;;  %v3636_v12 = vcombine.low %v1843_v3, %v1847_v7  ;;  %v3555_v3 = vcombine.high %v1758_v62, %v1762_v61  ;;  %v1769_v7 = vld [vmem:[%s4888_s27 + $0xb0] sm:$0xff] }
 0x5ae   : > { %2539 = vmatprep.subr.bf16.mxu0 %v3637_v10  ;;  %v1770_v10 = vld [vmem:[%s4888_s27 + $0xb8] sm:$0xff] }
 0x5af   : > { %2571 = vmatpush1.bf16.msra.mxu1 %v3590_v16  ;;  %v1855_v16 = vld [vmem:[%s4888_s27 + $0x360] sm:$0xff]  ;;  %2540 = vmatpush1.bf16.msra.mxu0 %v3636_v12  ;;  %v3554_v12 = vcombine.low %v1758_v62, %v1762_v61 }
 0x5b0   : > { %2572 = vmatprep.subr.bf16.mxu1 %v3599_v18  ;;  %v3644_v18 = vcombine.low %v1851_v15, %v1855_v16  ;;  %v3645_v19 = vcombine.high %v1851_v15, %v1855_v16  ;;  %v1773_v15 = vld [vmem:[%s4888_s27 + $0xd0] sm:$0xff] }
 0x5b1   : > { %v1777_v16 = vld [vmem:[%s4888_s27 + $0xf0] sm:$0xff] }
 0x5b2   : > { %2541 = vmatprep.subr.bf16.mxu0 %v3645_v19  ;;  %v3569_v21 = vcombine.high %v1773_v15, %v1777_v16 }
 0x5b3   : > { %2573 = vmatpush1.bf16.msra.mxu1 %v3598_v24  ;;  %v3647_v24 = vcombine.high %v1852_v17, %v1856_v20  ;;  %2542 = vmatpush1.bf16.msra.mxu0 %v3644_v18  ;;  %v1774_v17 = vld [vmem:[%s4888_s27 + $0xd8] sm:$0xff]  ;;  %v3562_v20 = vcombine.low %v1766_v8, %v1770_v10 }
 0x5b4   : > { %2574 = vmatprep.subr.bf16.mxu1 %v3607_v26  ;;  %v1860_v26 = vld [vmem:[%s4888_s27 + $0x388] sm:$0xff]  ;;  %2543 = vmatprep.subr.bf16.mxu0 %v3653_v25  ;;  %v1778_v18 = vld [vmem:[%s4888_s27 + $0xf8] sm:$0xff] }
 0x5b5   : > { %v3655_v28 = vcombine.high %v1860_v26, %v1864_v27  ;;  %v3571_v22 = vcombine.high %v1774_v17, %v1778_v18  ;;  %v1782_v25 = vld [vmem:[%s4888_s27 + $0x118] sm:$0xff] }
 0x5b7   : > { %2575 = vmatpush1.bf16.msra.mxu1 %v3606_v32  ;;  %v1872_v32 = vld [vmem:[%s4888_s27 + $0x3e8] sm:$0xff]  ;;  %2544 = vmatpush1.bf16.msra.mxu0 %v3652_v33  ;;  %v1790_v33 = vld [vmem:[%s4888_s27 + $0x158] sm:$0xff] }
 0x5b8   : > { %2576 = vmatprep.subr.bf16.mxu1 %v3615_v34  ;;  %v3654_v34 = vcombine.low %v1860_v26, %v1864_v27  ;;  %v3663_v5 = vcombine.high %v1868_v31, %v1872_v32  ;;  %2545 = vmatprep.subr.bf16.mxu0 %v3661_v4  ;;  %v3662_v9 = vcombine.low %v1868_v31, %v1872_v32  ;;  %v1786_v26 = vld [vmem:[%s4888_s27 + $0x138] sm:$0xff]  ;;  %v1789_v31 = vld [vmem:[%s4888_s27 + $0x150] sm:$0xff] }
 0x5b9   : > { %v3568_v27 = vcombine.low %v1773_v15, %v1777_v16  ;;  %v3579_v30 = vcombine.high %v1782_v25, %v1786_v26  ;;  %v1793_v32 = vld [vmem:[%s4888_s27 + $0x170] sm:$0xff]  ;;  %v1834_v15 = vld [vmem:[%s4888_s27 + $0x2b8] sm:$0xff] }
 0x5bb   : > { %2577 = vmatpush1.bf16.msra.mxu1 %v3614_v36  ;;  %2546 = vmatpush1.bf16.msra.mxu0 %v3660_v6  ;;  %v1753_v36 = vld [vmem:[%s4888_s27 + $0x30] sm:$0xff]  ;;  %v3585_v6 = vcombine.high %v1789_v31, %v1793_v32 }
 0x5bc   : > { %2578 = vmatprep.subr.bf16.mxu1 %v3623_v38  ;;  %v3545_v38 = vcombine.high %v1749_v35, %v1753_v36 }
 0x5be   : > { %2601 = vmatprep.subr.bf16.mxu0 %v3545_v38  ;;  %v1802_v38 = vld [vmem:[%s4888_s27 + $0x1b8] sm:$0xff] }
 0x5bf   : > { %2579 = vmatpush1.bf16.msra.mxu1 %v3622_v40  ;;  %v3544_v40 = vcombine.low %v1749_v35, %v1753_v36  ;;  %v1797_v35 = vld [vmem:[%s4888_s27 + $0x190] sm:$0xff] }
 0x5c0   : > { %2580 = vmatprep.subr.bf16.mxu1 %v3631_v2  ;;  %v3553_v2 = vcombine.high %v1757_v59, %v1761_v60  ;;  %v1801_v36 = vld [vmem:[%s4888_s27 + $0x1b0] sm:$0xff] }
 0x5c3   : > { %2581 = vmatpush1.bf16.msra.mxu1 %v3630_v1  ;;  %v1765_v1 = vld [vmem:[%s4888_s27 + $0x90] sm:$0xff] }
 0x5c4   : > { %2582 = vmatprep.subr.bf16.mxu1 %v3639_v14  ;;  %v3563_v14 = vcombine.high %v1766_v8, %v1770_v10  ;;  %v3560_v19 = vcombine.low %v1765_v1, %v1769_v7 }
 0x5c7   : > { %2583 = vmatpush1.bf16.msra.mxu1 %v3638_v13  ;;  %v3561_v13 = vcombine.high %v1765_v1, %v1769_v7  ;;  %v1825_v1 = vld [vmem:[%s4888_s27 + $0x270] sm:$0xff] }
 0x5c8   : > { %2584 = vmatprep.subr.bf16.mxu1 %v3647_v24  ;;  %v1785_v24 = vld [vmem:[%s4888_s27 + $0x130] sm:$0xff] }
 0x5cb   : > { %2585 = vmatpush1.bf16.msra.mxu1 %v3646_v23  ;;  %v1781_v23 = vld [vmem:[%s4888_s27 + $0x110] sm:$0xff] }
 0x5cc   : > { %2586 = vmatprep.subr.bf16.mxu1 %v3655_v28  ;;  %v3570_v28 = vcombine.low %v1774_v17, %v1778_v18  ;;  %v3577_v29 = vcombine.high %v1781_v23, %v1785_v24  ;;  %v3576_v4 = vcombine.low %v1781_v23, %v1785_v24  ;;  %v1842_v23 = vld [vmem:[%s4888_s27 + $0x2f8] sm:$0xff] }
 0x5cf   : > { %2587 = vmatpush1.bf16.msra.mxu1 %v3654_v34  ;;  %v1794_v34 = vld [vmem:[%s4888_s27 + $0x178] sm:$0xff] }
 0x5d0   : > { %2588 = vmatprep.subr.bf16.mxu1 %v3663_v5  ;;  %v3578_v5 = vcombine.low %v1782_v25, %v1786_v26 }
 0x5d3   : > { %2589 = vmatpush1.bf16.msra.mxu1 %v3662_v9  ;;  %v3587_v9 = vcombine.high %v1790_v33, %v1794_v34 }
 0x669   : > { %v1712_v41 = vpop.f32.mrb[16].mxu1 }
 0x66a   : > { %v5149_v43 = vadd.f32 %v4235_v42, %v1712_v41  ;;  %v1714_v44 = vpop.f32.mrb[17].mxu1  ;;  %v3546_v41 = vcombine.low %v1750_v37, %v1754_v39  ;;  %v3547_v42 = vcombine.high %v1750_v37, %v1754_v39  ;;  %v1798_v37 = vld [vmem:[%s4888_s27 + $0x198] sm:$0xff]  ;;  %v3584_v39 = vcombine.low %v1789_v31, %v1793_v32 }
 0x66b   : > { %v5151_v46 = vadd.f32 %v4236_v45, %v1714_v44  ;;  %v1716_v47 = vpop.f32.mrb[18].mxu1  ;;  %v1850_v31 = vld [vmem:[%s4888_s27 + $0x338] sm:$0xff] }
 0x66c   : > { %v5153_v49 = vadd.f32 %v4237_v48, %v1716_v47  ;;  %v1718_v50 = vpop.f32.mrb[19].mxu1  ;;  %v1725_v51 = vmul.f32 %v5149_v43, %v5149_v43  ;;  %2644 = vmatprep.subr.bf16.mxu1 %v3547_v42  ;;  %v3595_v42 = vcombine.high %v1798_v37, %v1802_v38 }
 0x66d   : > { %v5157_v53 = vadd.f32 %v4238_v52, %v1718_v50  ;;  %v1726_v54 = vmul.f32 %v5151_v46, %v5151_v46 }
 0x66e   : > { %v1727_v55 = vmul.f32 %v5153_v49, %v5153_v49 }
 0x66f   : > { %v1729_v56 = vadd.f32 %v1726_v54, %v1725_v51  ;;  %v1728_v57 = vmul.f32 %v5157_v53, %v5157_v53 }
 0x671   : > { %1730 = vadd.xlane.f32.xlu0 %v1729_v56  ;;  %v1732_v58 = vadd.f32 %v1728_v57, %v1727_v55 }
 0x673   : > { %1733 = vadd.xlane.f32.xlu1 %v1732_v58 }
 0x6fe   : > { %v1731_v44 = vpop.xlane.xlu0 %1730 }
 0x6ff   : > { %v1735_v45 = vmul.f32 0.00390625, %v1731_v44  ;;  %v1805_v44 = vld [vmem:[%s4888_s27 + $0x1d0] sm:$0xff] }
 0x700   : > { %v1734_v47 = vpop.xlane.xlu1 %1733 }
 0x701   : > { %v1737_v48 = vadd.f32 1e-06, %v1735_v45  ;;  %v1736_v50 = vmul.f32 0.00390625, %v1734_v47  ;;  %v1809_v45 = vld [vmem:[%s4888_s27 + $0x1f0] sm:$0xff]  ;;  %v1806_v47 = vld [vmem:[%s4888_s27 + $0x1d8] sm:$0xff] }
 0x702   : > { %v3600_v59 = vcombine.low %v1805_v44, %v1809_v45 }
 0x703   : > { %4199 = vrsqrt.f32 %v1737_v48  ;;  %v1738_v51 = vadd.f32 1e-06, %v1736_v50  ;;  %v1810_v48 = vld [vmem:[%s4888_s27 + $0x1f8] sm:$0xff]  ;;  %v3592_v50 = vcombine.low %v1797_v35, %v1801_v36 }
 0x704   : > { %v3602_v60 = vcombine.low %v1806_v47, %v1810_v48 }
 0x705   : > { %4201 = vrsqrt.f32 %v1738_v51  ;;  %v3594_v51 = vcombine.low %v1798_v37, %v1802_v38 }
 0x70d   : > { %v4200_v52 = vpop.eup %4199 }
 0x70e   : > { %v1742_v55 = vmul.f32 %v4200_v52, %v5151_v46  ;;  %v1741_v57 = vmul.f32 %v4200_v52, %v5149_v43  ;;  %v3601_v52 = vcombine.high %v1805_v44, %v1809_v45  ;;  %v1866_v44 = vld [vmem:[%s4888_s27 + $0x3b8] sm:$0xff] }
 0x70f   : > { %v4202_v54 = vpop.eup %4201 }
 0x710   : > { %v1744_v56 = vmul.f32 %v4202_v54, %v5157_v53  ;;  %v1743_v58 = vmul.f32 %v4202_v54, %v5153_v49  ;;  %v3603_v54 = vcombine.high %v1806_v47, %v1810_v48 }
 0x712   : > { %v1746_v63 = vpack.c.bf16 %v1744_v56, %v1742_v55  ;;  %v5197_v0 = vpack.c.bf16 %v1743_v58, %v1741_v57  ;;  %v1813_v55 = vld [vmem:[%s4888_s27 + $0x210] sm:$0xff]  ;;  %v1814_v57 = vld [vmem:[%s4888_s27 + $0x218] sm:$0xff] }
 0x713   : > { %v1817_v56 = vld [vmem:[%s4888_s27 + $0x230] sm:$0xff]  ;;  %v1818_v58 = vld [vmem:[%s4888_s27 + $0x238] sm:$0xff] }
 0x714   : > { %2547 = vmatprep.mubr.bf16.mxu0 %v1746_v63  ;;  %2590 = vmatprep.mubr.bf16.mxu1 %v1746_v63  ;;  %v3609_v62 = vcombine.high %v1813_v55, %v1817_v56  ;;  %v3611_v61 = vcombine.high %v1814_v57, %v1818_v58  ;;  %v3608_v7 = vcombine.low %v1813_v55, %v1817_v56  ;;  %v1874_v55 = vld [vmem:[%s4888_s27 + $0x3f8] sm:$0xff] }
 0x715   : > { %2548 = vmatmul.mubr.bf16.vlgmr.msra.gmra.mrb[12].mxu0 %v5197_v0  ;;  %2591 = vmatmul.mubr.bf16.vlgmr.msra.gmra.mrb[20].mxu1 %v5197_v0  ;;  %v3610_v8 = vcombine.low %v1814_v57, %v1818_v58 }
 0x716   : > { %2602 = vmatpush1.bf16.msra.mxu0 %v3544_v40  ;;  %2645 = vmatpush1.bf16.msra.mxu1 %v3546_v41  ;;  %v3586_v40 = vcombine.low %v1790_v33, %v1794_v34  ;;  %v3593_v41 = vcombine.high %v1797_v35, %v1801_v36  ;;  %v1858_v35 = vld [vmem:[%s4888_s27 + $0x378] sm:$0xff] }
 0x717   : > { %2633 = vmatprep.mubr.bf16.mxu0 %v1746_v63  ;;  %2676 = vmatprep.mubr.bf16.mxu1 %v1746_v63  ;;  %v1821_v63 = vld [vmem:[%s4888_s27 + $0x250] sm:$0xff] }
 0x718   : > { %2603 = vmatprep.subr.bf16.mxu0 %v3553_v2  ;;  %2646 = vmatprep.subr.bf16.mxu1 %v3555_v3  ;;  %v1822_v2 = vld [vmem:[%s4888_s27 + $0x258] sm:$0xff]  ;;  %v3617_v10 = vcombine.high %v1821_v63, %v1825_v1  ;;  %v3616_v16 = vcombine.low %v1821_v63, %v1825_v1  ;;  %v4083_v63 = vld [vmem:[%s4894_s24] ss:$8 sps:$4 sm:$0xff]  }
 0x719   : > { %v1826_v3 = vld [vmem:[%s4888_s27 + $0x278] sm:$0xff] }
 0x71a   : > { %2604 = vmatpush1.bf16.msra.mxu0 %v3552_v11  ;;  %2647 = vmatpush1.bf16.msra.mxu1 %v3554_v12  ;;  %v3619_v11 = vcombine.high %v1822_v2, %v1826_v3  ;;  %v1829_v12 = vld [vmem:[%s4888_s27 + $0x290] sm:$0xff]  ;;  %v3618_v17 = vcombine.low %v1822_v2, %v1826_v3  ;;  %v4091_v3 = vld [vmem:[%s4894_s24 + $0x24] ss:$8 sps:$4 sm:$0xff]  }
 0x71b   : > { %2605 = vmatprep.subr.bf16.mxu0 %v3561_v13  ;;  %2648 = vmatprep.subr.bf16.mxu1 %v3563_v14  ;;  %v1833_v13 = vld [vmem:[%s4888_s27 + $0x2b0] sm:$0xff]  ;;  %v1830_v14 = vld [vmem:[%s4888_s27 + $0x298] sm:$0xff] }
 0x71c   : > { %v3625_v18 = vcombine.high %v1829_v12, %v1833_v13  ;;  %v3624_v24 = vcombine.low %v1829_v12, %v1833_v13  ;;  %v3626_v25 = vcombine.low %v1830_v14, %v1834_v15  ;;  %v4088_v1 = vld [vmem:[%s4894_s24 + $0x14] ss:$8 sps:$4 sm:$0xff]   ;;  %v4086_v2 = vld [vmem:[%s4894_s24 + $0x10] ss:$8 sps:$4 sm:$0xff]  }
 0x71d   : > { %v4100_v12 = vld [vmem:[%s4894_s24 + $0x54] ss:$8 sps:$4 sm:$0xff]   ;;  %v4098_v13 = vld [vmem:[%s4894_s24 + $0x50] ss:$8 sps:$4 sm:$0xff]  }
 0x71e   : > { %2606 = vmatpush1.bf16.msra.mxu0 %v3560_v19  ;;  %2649 = vmatpush1.bf16.msra.mxu1 %v3562_v20  ;;  %v3627_v19 = vcombine.high %v1830_v14, %v1834_v15  ;;  %v1837_v20 = vld [vmem:[%s4888_s27 + $0x2d0] sm:$0xff]  ;;  %v4103_v14 = vld [vmem:[%s4894_s24 + $0x64] ss:$8 sps:$4 sm:$0xff]   ;;  %v4101_v15 = vld [vmem:[%s4894_s24 + $0x60] ss:$8 sps:$4 sm:$0xff]  }
 0x71f   : > { %2607 = vmatprep.subr.bf16.mxu0 %v3569_v21  ;;  %2650 = vmatprep.subr.bf16.mxu1 %v3571_v22  ;;  %v1841_v21 = vld [vmem:[%s4888_s27 + $0x2f0] sm:$0xff]  ;;  %v1838_v22 = vld [vmem:[%s4888_s27 + $0x2d8] sm:$0xff] }
 0x720   : > { %v3633_v26 = vcombine.high %v1837_v20, %v1841_v21  ;;  %v3632_v32 = vcombine.low %v1837_v20, %v1841_v21  ;;  %v3634_v33 = vcombine.low %v1838_v22, %v1842_v23  ;;  %v4112_v20 = vld [vmem:[%s4894_s24 + $0x94] ss:$8 sps:$4 sm:$0xff]   ;;  %v4110_v21 = vld [vmem:[%s4894_s24 + $0x90] ss:$8 sps:$4 sm:$0xff]  }
 0x722   : > { %2608 = vmatpush1.bf16.msra.mxu0 %v3568_v27  ;;  %2651 = vmatpush1.bf16.msra.mxu1 %v3570_v28  ;;  %v3635_v27 = vcombine.high %v1838_v22, %v1842_v23  ;;  %v1845_v28 = vld [vmem:[%s4888_s27 + $0x310] sm:$0xff]  ;;  %v4115_v22 = vld [vmem:[%s4894_s24 + $0xa4] ss:$8 sps:$4 sm:$0xff]   ;;  %v4113_v23 = vld [vmem:[%s4894_s24 + $0xa0] ss:$8 sps:$4 sm:$0xff]  }
 0x723   : > { %2609 = vmatprep.subr.bf16.mxu0 %v3577_v29  ;;  %2652 = vmatprep.subr.bf16.mxu1 %v3579_v30  ;;  %v1849_v29 = vld [vmem:[%s4888_s27 + $0x330] sm:$0xff]  ;;  %v1846_v30 = vld [vmem:[%s4888_s27 + $0x318] sm:$0xff] }
 0x724   : > { %v3641_v34 = vcombine.high %v1845_v28, %v1849_v29  ;;  %v3640_v36 = vcombine.low %v1845_v28, %v1849_v29  ;;  %v3642_v37 = vcombine.low %v1846_v30, %v1850_v31  ;;  %v4124_v28 = vld [vmem:[%s4894_s24 + $0xd4] ss:$8 sps:$4 sm:$0xff]   ;;  %v4122_v29 = vld [vmem:[%s4894_s24 + $0xd0] ss:$8 sps:$4 sm:$0xff]  }
 0x726   : > { %2610 = vmatpush1.bf16.msra.mxu0 %v3576_v4  ;;  %2653 = vmatpush1.bf16.msra.mxu1 %v3578_v5  ;;  %v3643_v4 = vcombine.high %v1846_v30, %v1850_v31  ;;  %v1853_v5 = vld [vmem:[%s4888_s27 + $0x350] sm:$0xff]  ;;  %v4125_v30 = vld [vmem:[%s4894_s24 + $0xe0] ss:$8 sps:$4 sm:$0xff]   ;;  %v4127_v31 = vld [vmem:[%s4894_s24 + $0xe4] ss:$8 sps:$4 sm:$0xff]  }
 0x727   : > { %2611 = vmatprep.subr.bf16.mxu0 %v3585_v6  ;;  %2654 = vmatprep.subr.bf16.mxu1 %v3587_v9  ;;  %v1857_v6 = vld [vmem:[%s4888_s27 + $0x370] sm:$0xff]  ;;  %v1854_v9 = vld [vmem:[%s4888_s27 + $0x358] sm:$0xff] }
 0x728   : > { %v3649_v38 = vcombine.high %v1853_v5, %v1857_v6  ;;  %v3648_v45 = vcombine.low %v1853_v5, %v1857_v6  ;;  %v3650_v47 = vcombine.low %v1854_v9, %v1858_v35 }
 0x72a   : > { %2612 = vmatpush1.bf16.msra.mxu0 %v3584_v39  ;;  %2655 = vmatpush1.bf16.msra.mxu1 %v3586_v40  ;;  %v3651_v39 = vcombine.high %v1854_v9, %v1858_v35  ;;  %v1861_v40 = vld [vmem:[%s4888_s27 + $0x390] sm:$0xff] }
 0x72b   : > { %2613 = vmatprep.subr.bf16.mxu0 %v3593_v41  ;;  %2656 = vmatprep.subr.bf16.mxu1 %v3595_v42  ;;  %v1865_v41 = vld [vmem:[%s4888_s27 + $0x3b0] sm:$0xff]  ;;  %v1862_v42 = vld [vmem:[%s4888_s27 + $0x398] sm:$0xff] }
 0x72c   : > { %v3657_v48 = vcombine.high %v1861_v40, %v1865_v41  ;;  %v3656_v56 = vcombine.low %v1861_v40, %v1865_v41  ;;  %v3658_v57 = vcombine.low %v1862_v42, %v1866_v44 }
 0x72e   : > { %2614 = vmatpush1.bf16.msra.mxu0 %v3592_v50  ;;  %2657 = vmatpush1.bf16.msra.mxu1 %v3594_v51  ;;  %v3659_v50 = vcombine.high %v1862_v42, %v1866_v44  ;;  %v1869_v51 = vld [vmem:[%s4888_s27 + $0x3d0] sm:$0xff] }
 0x72f   : > { %2615 = vmatprep.subr.bf16.mxu0 %v3601_v52  ;;  %2658 = vmatprep.subr.bf16.mxu1 %v3603_v54  ;;  %v1873_v52 = vld [vmem:[%s4888_s27 + $0x3f0] sm:$0xff]  ;;  %v1870_v54 = vld [vmem:[%s4888_s27 + $0x3d8] sm:$0xff] }
 0x730   : > { %v3665_v58 = vcombine.high %v1869_v51, %v1873_v52 }
 0x732   : > { %2616 = vmatpush1.bf16.msra.mxu0 %v3600_v59  ;;  %2659 = vmatpush1.bf16.msra.mxu1 %v3602_v60  ;;  %v3667_v59 = vcombine.high %v1870_v54, %v1874_v55  ;;  %v3664_v60 = vcombine.low %v1869_v51, %v1873_v52 }
 0x733   : > { %2617 = vmatprep.subr.bf16.mxu0 %v3609_v62  ;;  %2660 = vmatprep.subr.bf16.mxu1 %v3611_v61  ;;  %v3666_v62 = vcombine.low %v1870_v54, %v1874_v55  ;;  %v4085_v61 = vld [vmem:[%s4894_s24 + $0x4] ss:$8 sps:$4 sm:$0xff]  }
 0x736   : > { %2618 = vmatpush1.bf16.msra.mxu0 %v3608_v7  ;;  %2661 = vmatpush1.bf16.msra.mxu1 %v3610_v8  ;;  %v4089_v7 = vld [vmem:[%s4894_s24 + $0x20] ss:$8 sps:$4 sm:$0xff]   ;;  %v4092_v8 = vld [vmem:[%s4894_s24 + $0x30] ss:$8 sps:$4 sm:$0xff]  }
 0x737   : > { %2619 = vmatprep.subr.bf16.mxu0 %v3617_v10  ;;  %2662 = vmatprep.subr.bf16.mxu1 %v3619_v11  ;;  %v4097_v10 = vld [vmem:[%s4894_s24 + $0x44] ss:$8 sps:$4 sm:$0xff]   ;;  %v4095_v11 = vld [vmem:[%s4894_s24 + $0x40] ss:$8 sps:$4 sm:$0xff]  }
 0x73a   : > { %2620 = vmatpush1.bf16.msra.mxu0 %v3616_v16  ;;  %2663 = vmatpush1.bf16.msra.mxu1 %v3618_v17  ;;  %v4106_v16 = vld [vmem:[%s4894_s24 + $0x74] ss:$8 sps:$4 sm:$0xff]   ;;  %v4104_v17 = vld [vmem:[%s4894_s24 + $0x70] ss:$8 sps:$4 sm:$0xff]  }
 0x73b   : > { %2621 = vmatprep.subr.bf16.mxu0 %v3625_v18  ;;  %2664 = vmatprep.subr.bf16.mxu1 %v3627_v19  ;;  %v4109_v18 = vld [vmem:[%s4894_s24 + $0x84] ss:$8 sps:$4 sm:$0xff]   ;;  %v4107_v19 = vld [vmem:[%s4894_s24 + $0x80] ss:$8 sps:$4 sm:$0xff]  }
 0x73e   : > { %2622 = vmatpush1.bf16.msra.mxu0 %v3624_v24  ;;  %2665 = vmatpush1.bf16.msra.mxu1 %v3626_v25  ;;  %v4118_v24 = vld [vmem:[%s4894_s24 + $0xb4] ss:$8 sps:$4 sm:$0xff]   ;;  %v4116_v25 = vld [vmem:[%s4894_s24 + $0xb0] ss:$8 sps:$4 sm:$0xff]  }
 0x73f   : > { %2623 = vmatprep.subr.bf16.mxu0 %v3633_v26  ;;  %2666 = vmatprep.subr.bf16.mxu1 %v3635_v27  ;;  %v4121_v26 = vld [vmem:[%s4894_s24 + $0xc4] ss:$8 sps:$4 sm:$0xff]   ;;  %v4119_v27 = vld [vmem:[%s4894_s24 + $0xc0] ss:$8 sps:$4 sm:$0xff]  }
 0x742   : > { %2624 = vmatpush1.bf16.msra.mxu0 %v3632_v32  ;;  %2667 = vmatpush1.bf16.msra.mxu1 %v3634_v33  ;;  %v4130_v32 = vld [vmem:[%s4894_s24 + $0xf4] ss:$8 sps:$4 sm:$0xff]   ;;  %v4128_v33 = vld [vmem:[%s4894_s24 + $0xf0] ss:$8 sps:$4 sm:$0xff]  }
 0x743   : > { %2625 = vmatprep.subr.bf16.mxu0 %v3641_v34  ;;  %2668 = vmatprep.subr.bf16.mxu1 %v3643_v4  ;;  %v4133_v34 = vld [vmem:[%s4894_s24 + $0x104] ss:$8 sps:$4 sm:$0xff]  }
 0x746   : > { %2626 = vmatpush1.bf16.msra.mxu0 %v3640_v36  ;;  %2669 = vmatpush1.bf16.msra.mxu1 %v3642_v37 }
 0x747   : > { %2627 = vmatprep.subr.bf16.mxu0 %v3649_v38  ;;  %2670 = vmatprep.subr.bf16.mxu1 %v3651_v39 }
 0x74a   : > { %2628 = vmatpush1.bf16.msra.mxu0 %v3648_v45  ;;  %2671 = vmatpush1.bf16.msra.mxu1 %v3650_v47 }
 0x74b   : > { %2629 = vmatprep.subr.bf16.mxu0 %v3657_v48  ;;  %2672 = vmatprep.subr.bf16.mxu1 %v3659_v50 }
 0x74e   : > { %2630 = vmatpush1.bf16.msra.mxu0 %v3656_v56  ;;  %2673 = vmatpush1.bf16.msra.mxu1 %v3658_v57 }
 0x74f   : > { %2631 = vmatprep.subr.bf16.mxu0 %v3665_v58  ;;  %2674 = vmatprep.subr.bf16.mxu1 %v3667_v59 }
 0x752   : > { %2632 = vmatpush1.bf16.msra.mxu0 %v3664_v60  ;;  %2675 = vmatpush1.bf16.msra.mxu1 %v3666_v62 }
 0x753   : > { %3139 = vmatprep.subr.bf16.mxu0 %v4085_v61 }
 0x755   : > { %2634 = vmatmul.mubr.bf16.vlgmr.msra.gmra.mrb[16].mxu0 %v5197_v0  ;;  %2677 = vmatmul.mubr.bf16.vlgmr.msra.gmra.mrb[24].mxu1 %v5197_v0  ;;  %v4094_v0 = vld [vmem:[%s4894_s24 + $0x34] ss:$8 sps:$4 sm:$0xff]  }
 0x756   : > { %3140 = vmatpush1.bf16.msra.mxu0 %v4083_v63 }
 0x757   : > { %3141 = vmatprep.subr.bf16.mxu0 %v4088_v1 }
 0x75a   : > { %3142 = vmatpush1.bf16.msra.mxu0 %v4086_v2 }
 0x75b   : > { %3143 = vmatprep.subr.bf16.mxu0 %v4091_v3 }
 0x75e   : > { %3144 = vmatpush1.bf16.msra.mxu0 %v4089_v7 }
 0x75f   : > { %3145 = vmatprep.subr.bf16.mxu0 %v4094_v0 }
 0x762   : > { %3146 = vmatpush1.bf16.msra.mxu0 %v4092_v8 }
 0x763   : > { %3147 = vmatprep.subr.bf16.mxu0 %v4097_v10 }
 0x766   : > { %3148 = vmatpush1.bf16.msra.mxu0 %v4095_v11 }
 0x767   : > { %3149 = vmatprep.subr.bf16.mxu0 %v4100_v12 }
 0x76a   : > { %3150 = vmatpush1.bf16.msra.mxu0 %v4098_v13 }
 0x76b   : > { %3151 = vmatprep.subr.bf16.mxu0 %v4103_v14 }
 0x76e   : > { %3152 = vmatpush1.bf16.msra.mxu0 %v4101_v15 }
 0x76f   : > { %3153 = vmatprep.subr.bf16.mxu0 %v4106_v16 }
 0x772   : > { %3154 = vmatpush1.bf16.msra.mxu0 %v4104_v17 }
 0x773   : > { %3155 = vmatprep.subr.bf16.mxu0 %v4109_v18 }
 0x776   : > { %3156 = vmatpush1.bf16.msra.mxu0 %v4107_v19 }
 0x777   : > { %3157 = vmatprep.subr.bf16.mxu0 %v4112_v20 }
 0x77a   : > { %3158 = vmatpush1.bf16.msra.mxu0 %v4110_v21 }
 0x77b   : > { %3159 = vmatprep.subr.bf16.mxu0 %v4115_v22 }
 0x77e   : > { %3160 = vmatpush1.bf16.msra.mxu0 %v4113_v23 }
 0x77f   : > { %3161 = vmatprep.subr.bf16.mxu0 %v4118_v24 }
 0x782   : > { %3162 = vmatpush1.bf16.msra.mxu0 %v4116_v25 }
 0x783   : > { %3163 = vmatprep.subr.bf16.mxu0 %v4121_v26 }
 0x786   : > { %3164 = vmatpush1.bf16.msra.mxu0 %v4119_v27 }
 0x787   : > { %3165 = vmatprep.subr.bf16.mxu0 %v4124_v28 }
 0x78a   : > { %3166 = vmatpush1.bf16.msra.mxu0 %v4122_v29 }
 0x78b   : > { %3167 = vmatprep.subr.bf16.mxu0 %v4127_v31 }
 0x78e   : > { %3168 = vmatpush1.bf16.msra.mxu0 %v4125_v30 }
 0x78f   : > { %3169 = vmatprep.subr.bf16.mxu0 %v4130_v32 }
 0x792   : > { %3170 = vmatpush1.bf16.msra.mxu0 %v4128_v33 }
 0x793   : > { %3182 = vmatprep.subr.bf16.mxu0 %v4133_v34 }
 0x7e8   : > { %v2549_v4 = vpop.f32.mrb[12].mxu0  ;;  %v2592_v5 = vpop.f32.mrb[20].mxu1 }
 0x7e9   : > { %v2551_v6 = vpop.f32.mrb[13].mxu0  ;;  %v2594_v9 = vpop.f32.mrb[21].mxu1  ;;  %v3668_v39 = vmul.f32 -1.442695, %v2549_v4  ;;  %v3670_v40 = vmul.f32 -1.442695, %v2592_v5 }
 0x7ea   : > { %v2553_v35 = vpop.f32.mrb[14].mxu0  ;;  %v2596_v36 = vpop.f32.mrb[22].mxu1  ;;  %v3669_v41 = vmul.f32 -1.442695, %v2551_v6  ;;  %v3671_v42 = vmul.f32 -1.442695, %v2594_v9 }
 0x7eb   : > { %v2555_v37 = vpop.f32.mrb[15].mxu0  ;;  %v2598_v38 = vpop.f32.mrb[23].mxu1  ;;  %4203 = vpow2.f32 %v3668_v39  ;;  %v3672_v44 = vmul.f32 -1.442695, %v2553_v35  ;;  %v3674_v45 = vmul.f32 -1.442695, %v2596_v36 }
 0x7ec   : > { %4205 = vpow2.f32 %v3670_v40  ;;  %v3673_v47 = vmul.f32 -1.442695, %v2555_v37  ;;  %v3675_v48 = vmul.f32 -1.442695, %v2598_v38  ;;  %v4131_v39 = vld [vmem:[%s4894_s24 + $0x100] ss:$8 sps:$4 sm:$0xff]  }
 0x7ed   : > { %4207 = vpow2.f32 %v3669_v41  ;;  %v4136_v40 = vld [vmem:[%s4894_s24 + $0x114] ss:$8 sps:$4 sm:$0xff]   ;;  %v4134_v41 = vld [vmem:[%s4894_s24 + $0x110] ss:$8 sps:$4 sm:$0xff]  }
 0x7ee   : > { %4209 = vpow2.f32 %v3671_v42  ;;  %v4139_v42 = vld [vmem:[%s4894_s24 + $0x124] ss:$8 sps:$4 sm:$0xff]  }
 0x7ef   : > { %4211 = vpow2.f32 %v3672_v44  ;;  %v4137_v44 = vld [vmem:[%s4894_s24 + $0x120] ss:$8 sps:$4 sm:$0xff]  }
 0x7f0   : > { %4213 = vpow2.f32 %v3674_v45  ;;  %v4142_v45 = vld [vmem:[%s4894_s24 + $0x134] ss:$8 sps:$4 sm:$0xff]  }
 0x7f1   : > { %4215 = vpow2.f32 %v3673_v47  ;;  %v4140_v47 = vld [vmem:[%s4894_s24 + $0x130] ss:$8 sps:$4 sm:$0xff]  }
 0x7f2   : > { %4217 = vpow2.f32 %v3675_v48  ;;  %v4145_v48 = vld [vmem:[%s4894_s24 + $0x144] ss:$8 sps:$4 sm:$0xff]  }
 0x7f5   : > { %v4204_v50 = vpop.eup %4203 }
 0x7f6   : > { %v4206_v51 = vpop.eup %4205  ;;  %v2711_v55 = vadd.f32 1.0, %v4204_v50  ;;  %v4143_v50 = vld [vmem:[%s4894_s24 + $0x140] ss:$8 sps:$4 sm:$0xff]  }
 0x7f7   : > { %v4208_v52 = vpop.eup %4207  ;;  %v2713_v57 = vadd.f32 1.0, %v4206_v51  ;;  %v4148_v51 = vld [vmem:[%s4894_s24 + $0x154] ss:$8 sps:$4 sm:$0xff]  }
 0x7f8   : > { %v4210_v54 = vpop.eup %4209  ;;  %v2712_v59 = vadd.f32 1.0, %v4208_v52  ;;  %4219 = vrcp.f32 %v2711_v55  ;;  %v4146_v52 = vld [vmem:[%s4894_s24 + $0x150] ss:$8 sps:$4 sm:$0xff]   ;;  %v4149_v55 = vld [vmem:[%s4894_s24 + $0x160] ss:$8 sps:$4 sm:$0xff]  }
 0x7f9   : > { %v4212_v56 = vpop.eup %4211  ;;  %v2714_v62 = vadd.f32 1.0, %v4210_v54  ;;  %4221 = vrcp.f32 %v2713_v57  ;;  %v4151_v54 = vld [vmem:[%s4894_s24 + $0x164] ss:$8 sps:$4 sm:$0xff]   ;;  %v4152_v57 = vld [vmem:[%s4894_s24 + $0x170] ss:$8 sps:$4 sm:$0xff]  }
 0x7fa   : > { %v4214_v58 = vpop.eup %4213  ;;  %v2715_v63 = vadd.f32 1.0, %v4212_v56  ;;  %4223 = vrcp.f32 %v2712_v59  ;;  %v4154_v56 = vld [vmem:[%s4894_s24 + $0x174] ss:$8 sps:$4 sm:$0xff]   ;;  %v4155_v59 = vld [vmem:[%s4894_s24 + $0x180] ss:$8 sps:$4 sm:$0xff]  }
 0x7fb   : > { %v4216_v60 = vpop.eup %4215  ;;  %v2717_v1 = vadd.f32 1.0, %v4214_v58  ;;  %4225 = vrcp.f32 %v2714_v62  ;;  %v4157_v58 = vld [vmem:[%s4894_s24 + $0x184] ss:$8 sps:$4 sm:$0xff]   ;;  %v4158_v62 = vld [vmem:[%s4894_s24 + $0x190] ss:$8 sps:$4 sm:$0xff]  }
 0x7fc   : > { %v4218_v61 = vpop.eup %4217  ;;  %v2716_v2 = vadd.f32 1.0, %v4216_v60  ;;  %4227 = vrcp.f32 %v2715_v63  ;;  %v4160_v60 = vld [vmem:[%s4894_s24 + $0x194] ss:$8 sps:$4 sm:$0xff]   ;;  %v4161_v63 = vld [vmem:[%s4894_s24 + $0x1a0] ss:$8 sps:$4 sm:$0xff]  }
 0x7fd   : > { %v2718_v3 = vadd.f32 1.0, %v4218_v61  ;;  %4229 = vrcp.f32 %v2717_v1  ;;  %v4163_v61 = vld [vmem:[%s4894_s24 + $0x1a4] ss:$8 sps:$4 sm:$0xff]   ;;  %v4166_v1 = vld [vmem:[%s4894_s24 + $0x1b4] ss:$8 sps:$4 sm:$0xff]  }
 0x7fe   : > { %4231 = vrcp.f32 %v2716_v2  ;;  %v4164_v2 = vld [vmem:[%s4894_s24 + $0x1b0] ss:$8 sps:$4 sm:$0xff]  }
 0x7ff   : > { %4233 = vrcp.f32 %v2718_v3  ;;  %v4169_v3 = vld [vmem:[%s4894_s24 + $0x1c4] ss:$8 sps:$4 sm:$0xff]  }
 0x802   : > { %v4220_v7 = vpop.eup %4219 }
 0x803   : > { %v4222_v0 = vpop.eup %4221  ;;  %v2735_v15 = vmul.f32 %v4220_v7, %v2549_v4  ;;  %v4167_v7 = vld [vmem:[%s4894_s24 + $0x1c0] ss:$8 sps:$4 sm:$0xff]  }
 0x804   : > { %v4224_v8 = vpop.eup %4223  ;;  %v2737_v16 = vmul.f32 %v4222_v0, %v2592_v5  ;;  %v4172_v0 = vld [vmem:[%s4894_s24 + $0x1d4] ss:$8 sps:$4 sm:$0xff]  }
 0x805   : > { %v4226_v10 = vpop.eup %4225  ;;  %v2736_v17 = vmul.f32 %v4224_v8, %v2551_v6  ;;  %v4170_v8 = vld [vmem:[%s4894_s24 + $0x1d0] ss:$8 sps:$4 sm:$0xff]  }
 0x806   : > { %v4228_v11 = vpop.eup %4227  ;;  %v2738_v18 = vmul.f32 %v4226_v10, %v2594_v9  ;;  %v4175_v10 = vld [vmem:[%s4894_s24 + $0x1e4] ss:$8 sps:$4 sm:$0xff]  }
 0x807   : > { %v4230_v12 = vpop.eup %4229  ;;  %v2739_v21 = vmul.f32 %v4228_v11, %v2553_v35  ;;  %v4173_v11 = vld [vmem:[%s4894_s24 + $0x1e0] ss:$8 sps:$4 sm:$0xff]  }
 0x808   : > { %v4232_v13 = vpop.eup %4231  ;;  %v2741_v22 = vmul.f32 %v4230_v12, %v2596_v36  ;;  %v4178_v12 = vld [vmem:[%s4894_s24 + $0x1f4] ss:$8 sps:$4 sm:$0xff]  }
 0x809   : > { %v4234_v14 = vpop.eup %4233  ;;  %v2740_v27 = vmul.f32 %v4232_v13, %v2555_v37  ;;  %v4176_v13 = vld [vmem:[%s4894_s24 + $0x1f0] ss:$8 sps:$4 sm:$0xff]  }
 0x80a   : > { %v2742_v28 = vmul.f32 %v4234_v14, %v2598_v38 }
 0x828   : > { %v2635_v19 = vpop.f32.mrb[16].mxu0  ;;  %v2678_v20 = vpop.f32.mrb[24].mxu1 }
 0x829   : > { %v2743_v23 = vmul.f32 %v2735_v15, %v2635_v19  ;;  %v5292_v24 = vmul.f32 %v2737_v16, %v2678_v20  ;;  %v2637_v25 = vpop.f32.mrb[17].mxu0  ;;  %v2680_v26 = vpop.f32.mrb[25].mxu1 }
 0x82a   : > { %v2744_v29 = vmul.f32 %v2736_v17, %v2637_v25  ;;  %v2746_v30 = vmul.f32 %v2738_v18, %v2680_v26  ;;  %v2639_v31 = vpop.f32.mrb[18].mxu0  ;;  %v2682_v32 = vpop.f32.mrb[26].mxu1 }
 0x82b   : > { %v2747_v33 = vmul.f32 %v2739_v21, %v2639_v31  ;;  %v5294_v34 = vmul.f32 %v2741_v22, %v2682_v32  ;;  %v2641_v4 = vpop.f32.mrb[19].mxu0  ;;  %v2684_v5 = vpop.f32.mrb[27].mxu1 }
 0x82c   : > { %v2748_v6 = vmul.f32 %v2740_v27, %v2641_v4  ;;  %v2750_v9 = vmul.f32 %v2742_v28, %v2684_v5 }
 0x82d   : > { %v2751_v35 = vpack.c.bf16 %v2747_v33, %v2743_v23  ;;  %v2753_v36 = vpack.c.bf16 %v5294_v34, %v5292_v24 }
 0x82e   : > { %v2752_v37 = vpack.c.bf16 %v2748_v6, %v2744_v29  ;;  %v2754_v38 = vpack.c.bf16 %v2750_v9, %v2746_v30 }
 0x830   : > { %3171 = vmatprep.mubr.bf16.mxu0 %v2752_v37 }
 0x831   : > { %3172 = vmatmul.mubr.bf16.vlgmr.msra.gmra.mrb[20].mxu0 %v2751_v35 }
 0x832   : > { %3183 = vmatpush1.bf16.msra.mxu0 %v4131_v39  ;;  %3214 = vmatprep.mubr.bf16.mxu0 %v2754_v38 }
 0x833   : > { %3184 = vmatprep.subr.bf16.mxu0 %v4136_v40 }
 0x836   : > { %3185 = vmatpush1.bf16.msra.mxu0 %v4134_v41 }
 0x837   : > { %3186 = vmatprep.subr.bf16.mxu0 %v4139_v42 }
 0x83a   : > { %3187 = vmatpush1.bf16.msra.mxu0 %v4137_v44 }
 0x83b   : > { %3188 = vmatprep.subr.bf16.mxu0 %v4142_v45 }
 0x83e   : > { %3189 = vmatpush1.bf16.msra.mxu0 %v4140_v47 }
 0x83f   : > { %3190 = vmatprep.subr.bf16.mxu0 %v4145_v48 }
 0x842   : > { %3191 = vmatpush1.bf16.msra.mxu0 %v4143_v50 }
 0x843   : > { %3192 = vmatprep.subr.bf16.mxu0 %v4148_v51 }
 0x846   : > { %3193 = vmatpush1.bf16.msra.mxu0 %v4146_v52 }
 0x847   : > { %3194 = vmatprep.subr.bf16.mxu0 %v4151_v54 }
 0x84a   : > { %3195 = vmatpush1.bf16.msra.mxu0 %v4149_v55 }
 0x84b   : > { %3196 = vmatprep.subr.bf16.mxu0 %v4154_v56 }
 0x84e   : > { %3197 = vmatpush1.bf16.msra.mxu0 %v4152_v57 }
 0x84f   : > { %3198 = vmatprep.subr.bf16.mxu0 %v4157_v58 }
 0x852   : > { %3199 = vmatpush1.bf16.msra.mxu0 %v4155_v59 }
 0x853   : > { %3200 = vmatprep.subr.bf16.mxu0 %v4160_v60 }
 0x856   : > { %3201 = vmatpush1.bf16.msra.mxu0 %v4158_v62 }
 0x857   : > { %3202 = vmatprep.subr.bf16.mxu0 %v4163_v61 }
 0x85a   : > { %3203 = vmatpush1.bf16.msra.mxu0 %v4161_v63 }
 0x85b   : > { %3204 = vmatprep.subr.bf16.mxu0 %v4166_v1 }
 0x85e   : > { %3205 = vmatpush1.bf16.msra.mxu0 %v4164_v2 }
 0x85f   : > { %3206 = vmatprep.subr.bf16.mxu0 %v4169_v3 }
 0x862   : > { %3207 = vmatpush1.bf16.msra.mxu0 %v4167_v7 }
 0x863   : > { %3208 = vmatprep.subr.bf16.mxu0 %v4172_v0 }
 0x866   : > { %3209 = vmatpush1.bf16.msra.mxu0 %v4170_v8 }
 0x867   : > { %3210 = vmatprep.subr.bf16.mxu0 %v4175_v10 }
 0x86a   : > { %3211 = vmatpush1.bf16.msra.mxu0 %v4173_v11 }
 0x86b   : > { %3212 = vmatprep.subr.bf16.mxu0 %v4178_v12 }
 0x86e   : > { %3213 = vmatpush1.bf16.msra.mxu0 %v4176_v13 }
 0x871   : > { %3215 = vmatmul.mubr.bf16.vlgmr.msra.gmra.mrb[20].mxu0 %v2753_v36 }
 0x944   : > { %v3216_v14 = vpop.f32.mrb[20].mxu0 }
 0x945   : > { %v3225_v15 = vadd.f32 %v3216_v14, %v5149_v43  ;;  %v3218_v16 = vpop.f32.mrb[21].mxu0 }
 0x946   : > { %v3226_v17 = vadd.f32 %v3218_v16, %v5151_v46  ;;  %v3220_v18 = vpop.f32.mrb[22].mxu0 }
 0x947   : > { %3229 = vst [vmem:[#allocation14] sm:$0xff] %v3225_v15  ;;  %v3227_v19 = vadd.f32 %v3220_v18, %v5153_v49  ;;  %v3222_v20 = vpop.f32.mrb[23].mxu0 }
 0x948   : > { %3230 = vst [vmem:[#allocation14 + $0x8] sm:$0xff] %v3226_v17  ;;  %v3228_v21 = vadd.f32 %v3222_v20, %v5157_v53 }
 0x949   : > { %3231 = vst [vmem:[#allocation14 + $0x10] sm:$0xff] %v3227_v19 }
 0x94a   : > { %3232 = vst [vmem:[#allocation14 + $0x18] sm:$0xff] %v3228_v21 }
 0x94b   : > { %4456 = shalt.err (!%p4453_p11)
}
 0x94c   : > { %s5442_s23 = sld [smem:[#allocation28_spill]] }
 0x952   : > { %s4457_s11 = scalar_lea.hbm %s5442_s23, 512 }
 0x953   : > { %p4458_p13 = scmp.ne.s32.totalorder %s5442_s23, %s4457_s11  ;;  %p4463_p8 = scmp.lt.u32.totalorder %s4457_s11, %s5442_s23 }
 0x955   : > { %p4459_p12 = pnand %p4458_p13, %p3840_p10 }
 0x957   : > { %p4460_p1 = pneg %p4459_p12 }
 0x959   : > { %p4465_p6 = pnand %p4463_p8, %p4460_p1 }
 0x95b   : > { %4468 = shalt.err (!%p4465_p6)
}
 0x95c   : > { %s4540_s10 = smov 256   ;;  %s4541_s16 = smov 16  }
 0x95d   : > { %3807 = dma.vmem_to_hbm [thread:$0]  (%p3840_p10), %s3240_s21, 512, %s5442_s23, [#allocation4], %s4540_s10, %s4540_s10, %s4541_s16  }
 0x95e   : > { %4502 = dma.done.wait (%p3840_p10), [#allocation4], 512  }
 0x95f   : > { %4504 = vsyncadd (%p3840_p10), [#allocation4], 4294966784 }
 0x960 PF: > { %s5443_s30 = sld [smem:[#allocation21_spill]]  ;;  %s5444_s13 = sld [smem:[#allocation20_spill]] }
 0x961   : > { %s5445_s29 = sld [smem:[#allocation22_spill]]  ;;  %s5446_s27 = smov %s4511_s28 }
 0x966   : > { %p24_p7 = scmp.ge.s32.totalorder %s5443_s30, 4   ;;  %s5447_s28 = smov %s5444_s13 }
 0x968   :  { %26 = sbr.rel (!%p24_p7) target bundleno = 14 (0xe), region = 141 }
 0x96f   :  { %3255 = vsyncpa [#allocation3], 1 }
 0x970   :  { %3257 = vsyncpa [#allocation3 + $0x1], 1 }
 0x971   :  { %3258 = vsyncpa [#allocation6], 1 }
 0x972   :  { %3260 = vsyncpa [#allocation6 + $0x1], 1 }
 0x973   :  { %3261 = vsyncpa [#allocation9], 1 }
 0x974   :  { %3263 = vsyncpa [#allocation9 + $0x1], 1 }
 0x975   :  { %3264 = vsyncpa [#allocation12], 1 }
 0x976   :  { %3265 = vsyncpa [#allocation4], 1 }
 0x977   :  { %3267 = vsyncpa [#allocation4 + $0x1], 1 }

</bundles_post_ra>
